<compile_context>
chip_gen: v7x
topology: tpu7x:2x2x1
jax: 0.10.0
libtpu: 0.0.40
codegen_flags: <defaults>
</compile_context>

<pallas_src>
import numpy as np
import jax
import jax.numpy as jnp
from jax.experimental import pallas as pl
from jax.experimental.pallas import tpu as pltpu

# ----------------------------- configuration --------------------------------
IN_FEATURES = 256
OUT_FEATURES = 128
VECTOR_LEN = 8              # vector_lens[1]
NUM_CENTROIDS = 32          # num_centroids[1]
NUM_RES_CENTROIDS = 16      # num_res_centroids[1]  (>0 -> residual enabled)
GROUP_NUM = 2               # == num_codebooks
GROUP_SIZE = 128            # in_features == outlier_size + group_num*group_size
OUTLIER_SIZE = 0
PADDING = (-OUT_FEATURES) % VECTOR_LEN
NUM_INDICES = (OUT_FEATURES + PADDING) // VECTOR_LEN
OUT_PAD = NUM_INDICES * VECTOR_LEN

MAIN_CODES = NUM_INDICES * NUM_CENTROIDS          # 16*32 = 512
RES_CODES = NUM_INDICES * NUM_RES_CENTROIDS       # 16*16 = 256
TOTAL_CODES = MAIN_CODES + RES_CODES              # 768

BATCH = 2
SEQ = 8


# ------------------------------- Pallas kernel -------------------------------
def _vq_gemm_kernel(x_ref, scale_ref, wbias_ref, perm_ref, onehot_ref, cb_ref,
                    bias_ref, out_ref):
    """Fused norm/perm/dequant/GEMM, single invocation (no grid).

    Steps (all operands VMEM-resident, ~1 MiB total):
      x_s   = (x * weight_scale)            broadcast VPU mul, f32, cast bf16
      norm  = sum_k x[:,k] * weight_bias[k] rank-1 term, f32 lane reduce
      xp    = x_s @ P                       exact 0/1 bf16 matmul (inverse perm)
      per codebook g (static 2-way unroll):
        W_g = onehot[g] @ cb_exp[g]         dequantized (group_size, out_pad)
        acc += xp[:, g] @ W_g
      out   = acc[:, :out] + norm + bias
    """
    x = x_ref[...]                                          # (B, 256) f32
    x_s = (x * scale_ref[...]).astype(jnp.bfloat16)         # weight_scale fold
    norm = jnp.sum(x * wbias_ref[...], axis=1, keepdims=True)   # (B, 1) f32

    # inverse permutation: xp[:, m] == x_s[:, perm[m]]  (0/1 matmul, exact)
    xp = jnp.dot(x_s, perm_ref[...], preferred_element_type=jnp.float32)

    acc = jnp.zeros((x.shape[0], OUT_PAD), jnp.float32)
    for g in range(GROUP_NUM):                              # static 2-way unroll
        # Dequantized weight tile for codebook g: (group_size, out_pad).
        w_g = jnp.dot(onehot_ref[g], cb_ref[g],
                      preferred_element_type=jnp.float32)
        x_g = xp[:, g * GROUP_SIZE:(g + 1) * GROUP_SIZE].astype(jnp.bfloat16)
        acc = acc + jnp.dot(x_g, w_g.astype(jnp.bfloat16),
                            preferred_element_type=jnp.float32)

    y = acc[:, :OUT_FEATURES]
    out_ref[...] = (y + norm + bias_ref[...]).astype(out_ref.dtype)


# -------------------- one-time (model-load) weight repacking -----------------
def pack_vquant_params(params):
    """Host-side (numpy) repack.  Runs ONCE at model-load time, never per call.

    Returns packed operands:
      onehot  : (G, group_size, total_codes) bf16, combined main++res one-hot
                (0/1 is exact in bf16; values never exceed 1).
      cb      : (G, total_codes, out_pad) bf16 block-diagonal codebook
                expansion:  cb[g, i*nc+c, i*vl+v] = centroids[g,c,v] (+res blk).
      perm_mat: (in, in) bf16 0/1 matrix with (x @ perm_mat)[:, m] = x[:, perm[m]].
      scale_row / wbias_row / bias_row: f32 row vectors.
    """
    cent = np.asarray(params["centroids"], np.float32).reshape(
        GROUP_NUM, NUM_CENTROIDS, VECTOR_LEN)
    rcent = np.asarray(params["res_centroids"], np.float32).reshape(
        GROUP_NUM, NUM_RES_CENTROIDS, VECTOR_LEN)
    idx = np.asarray(params["indices"]).astype(np.int64)       # (G, n_idx, gs)
    ridx = np.asarray(params["res_indices"]).astype(np.int64)  # (G, n_idx, gs)
    perm = np.asarray(params["perm"]).astype(np.int64)

    # Combined one-hot over the (main ++ residual) code axis.
    onehot = np.zeros((GROUP_NUM, GROUP_SIZE, TOTAL_CODES), np.float32)
    g_ix = np.arange(GROUP_NUM)[:, None, None]
    i_ix = np.arange(NUM_INDICES)[None, :, None]
    j_ix = np.arange(GROUP_SIZE)[None, None, :]
    onehot[g_ix, j_ix, i_ix * NUM_CENTROIDS + idx] = 1.0
    onehot[g_ix, j_ix, MAIN_CODES + i_ix * NUM_RES_CENTROIDS + ridx] = 1.0

    # Block-diagonal expanded codebooks.
    cb = np.zeros((GROUP_NUM, TOTAL_CODES, OUT_PAD), np.float32)
    for g in range(GROUP_NUM):
        for i in range(NUM_INDICES):
            cb[g, i * NUM_CENTROIDS:(i + 1) * NUM_CENTROIDS,
               i * VECTOR_LEN:(i + 1) * VECTOR_LEN] = cent[g]
            r0 = MAIN_CODES + i * NUM_RES_CENTROIDS
            cb[g, r0:r0 + NUM_RES_CENTROIDS,
               i * VECTOR_LEN:(i + 1) * VECTOR_LEN] = rcent[g]

    # Inverse-permutation 0/1 matrix.
    pmat = np.zeros((IN_FEATURES, IN_FEATURES), np.float32)
    pmat[perm, np.arange(IN_FEATURES)] = 1.0

    return {
        "scale_row": jnp.asarray(
            np.asarray(params["weight_scale"], np.float32).reshape(1, IN_FEATURES)),
        "wbias_row": jnp.asarray(
            np.asarray(params["weight_bias"], np.float32).reshape(1, IN_FEATURES)),
        "perm_mat": jnp.asarray(pmat, jnp.bfloat16),
        "onehot": jnp.asarray(onehot, jnp.bfloat16),
        "cb": jnp.asarray(cb, jnp.bfloat16),
        "bias_row": jnp.asarray(
            np.asarray(params["bias"], np.float32).reshape(1, OUT_FEATURES)),
    }


# ------------------------------- forward (jitted) -----------------------------
def vquant_linear_forward(x, packed):
    batch, seq, _ = x.shape
    bflat = batch * seq
    x_flat = x.reshape(bflat, IN_FEATURES).astype(jnp.float32)

    def vmem_spec():
        return pl.BlockSpec(memory_space=pltpu.MemorySpace.VMEM)

    out = pl.pallas_call(
        _vq_gemm_kernel,
        out_shape=jax.ShapeDtypeStruct((bflat, OUT_FEATURES), jnp.float32),
        in_specs=[vmem_spec() for _ in range(7)],
        out_specs=vmem_spec(),
    )(x_flat, packed["scale_row"], packed["wbias_row"], packed["perm_mat"],
      packed["onehot"], packed["cb"], packed["bias_row"])

    return out.reshape(batch, seq, OUT_FEATURES)


# ------------------------ pure-JAX reference (checking) -----------------------
def _dequant_weight_ref(params):
    cent = params["centroids"].reshape(GROUP_NUM, NUM_CENTROIDS, VECTOR_LEN)
    rcent = params["res_centroids"].reshape(GROUP_NUM, NUM_RES_CENTROIDS, VECTOR_LEN)
    idx = params["indices"].astype(jnp.int32)       # (ncb, ni, gs)
    ridx = params["res_indices"].astype(jnp.int32)
    gsel = jnp.arange(GROUP_NUM)[:, None, None]
    w = cent[gsel, idx] + rcent[gsel, ridx]          # (ncb, ni, gs, vl)
    w = jnp.transpose(w, (1, 3, 0, 2)).reshape(OUT_PAD, GROUP_NUM * GROUP_SIZE)
    w = w[:OUT_FEATURES]
    inv_perm = jnp.argsort(params["perm"])
    w = w[:, inv_perm]
    w = w * params["weight_scale"][None, :] + params["weight_bias"][None, :]
    return w


def _forward_ref(x, params):
    b, s, _ = x.shape
    x_flat = x.reshape(b * s, -1).astype(jnp.float32)
    w = _dequant_weight_ref(params)
    y = x_flat @ w.T + params["bias"][None, :]
    return y.reshape(b, s, OUT_FEATURES)


# ------------------------------------ main ------------------------------------
if __name__ == "__main__":
    key = jax.random.PRNGKey(0)
    ks = jax.random.split(key, 9)
    params = {
        # module stores int16 / (optionally fp16-viewed) indices; cast is glue.
        "centroids": 0.5 * jax.random.normal(
            ks[0], (GROUP_NUM, NUM_CENTROIDS * VECTOR_LEN), jnp.float32),
        "res_centroids": 0.1 * jax.random.normal(
            ks[1], (GROUP_NUM, NUM_RES_CENTROIDS * VECTOR_LEN), jnp.float32),
        "indices": jax.random.randint(
            ks[2], (GROUP_NUM, NUM_INDICES, GROUP_SIZE), 0, NUM_CENTROIDS,
            jnp.int32).astype(jnp.int16),
        "res_indices": jax.random.randint(
            ks[3], (GROUP_NUM, NUM_INDICES, GROUP_SIZE), 0, NUM_RES_CENTROIDS,
            jnp.int32).astype(jnp.int16),
        "perm": jax.random.permutation(ks[4], IN_FEATURES).astype(jnp.int32),
        "weight_scale": jax.random.uniform(
            ks[5], (IN_FEATURES,), jnp.float32, 0.5, 1.5),
        "weight_bias": 0.05 * jax.random.normal(ks[6], (IN_FEATURES,), jnp.float32),
        "bias": 0.1 * jax.random.normal(ks[7], (OUT_FEATURES,), jnp.float32),
    }
    x = jax.random.normal(ks[8], (BATCH, SEQ, IN_FEATURES), jnp.float32)

    # One-time, host-side repack (model-load time) — NOT in the per-call path.
    packed = pack_vquant_params(params)

    fwd = jax.jit(vquant_linear_forward)
    y = jax.block_until_ready(fwd(x, packed))
    y_ref = jax.block_until_ready(_forward_ref(x, params))

    assert y.shape == (BATCH, SEQ, OUT_FEATURES)
    # Tolerance sized for the bf16-MXU path (f32 reference): one bf16 rounding
    # of the scaled activations + one of the reconstructed weight, f32 MXU
    # accumulation (the previous "part" double-rounding has been removed).
    np.testing.assert_allclose(np.asarray(y), np.asarray(y_ref),
                               rtol=2e-2, atol=1e-1)
    print("KERNEL_OK")
</pallas_src>

<mosaic_0001>
module attributes {stable_mosaic.version = 11 : i64} {
  func.func @_vq_gemm_kernel(%arg0: memref<16x256xf32, #tpu.memory_space<vmem>>, %arg1: memref<1x256xf32, #tpu.memory_space<vmem>>, %arg2: memref<1x256xf32, #tpu.memory_space<vmem>>, %arg3: memref<256x256xbf16, #tpu.memory_space<vmem>>, %arg4: memref<2x128x768xbf16, #tpu.memory_space<vmem>>, %arg5: memref<2x768x128xbf16, #tpu.memory_space<vmem>>, %arg6: memref<1x128xf32, #tpu.memory_space<vmem>>, %arg7: memref<16x128xf32, #tpu.memory_space<vmem>>) attributes {dimension_semantics = [], scalar_prefetch = 0 : i64, scratch_operands = 0 : i64, tpu.core_type = #tpu.core_type<tc>} {
    %c0 = arith.constant 0 : index
    %c0_0 = arith.constant 0 : index
    %0 = vector.load %arg0[%c0, %c0_0] : memref<16x256xf32, #tpu.memory_space<vmem>>, vector<16x256xf32>
    %c0_1 = arith.constant 0 : index
    %c0_2 = arith.constant 0 : index
    %1 = vector.load %arg1[%c0_1, %c0_2] : memref<1x256xf32, #tpu.memory_space<vmem>>, vector<1x256xf32>
    %2 = vector.broadcast %1 : vector<1x256xf32> to vector<16x256xf32>
    %3 = arith.mulf %0, %2 : vector<16x256xf32>
    %4 = arith.truncf %3 : vector<16x256xf32> to vector<16x256xbf16>
    %c0_3 = arith.constant 0 : index
    %c0_4 = arith.constant 0 : index
    %5 = vector.load %arg2[%c0_3, %c0_4] : memref<1x256xf32, #tpu.memory_space<vmem>>, vector<1x256xf32>
    %6 = vector.broadcast %5 : vector<1x256xf32> to vector<16x256xf32>
    %7 = arith.mulf %0, %6 : vector<16x256xf32>
    %cst = arith.constant dense<0.000000e+00> : vector<16xf32>
    %8 = vector.multi_reduction <add>, %7, %cst [1] : vector<16x256xf32> to vector<16xf32>
    %9 = vector.shape_cast %8 : vector<16xf32> to vector<16x1xf32>
    %c0_5 = arith.constant 0 : index
    %c0_6 = arith.constant 0 : index
    %10 = vector.load %arg3[%c0_5, %c0_6] : memref<256x256xbf16, #tpu.memory_space<vmem>>, vector<256x256xbf16>
    %cst_7 = arith.constant dense<0.000000e+00> : vector<16x256xf32>
    %11 = tpu.matmul %4, %10, %cst_7 {dimension_numbers = #tpu.dot_dimension_numbers<[1], [0], [0], [1], [0, 0, 1, 1], [], []>} : vector<16x256xbf16>, vector<256x256xbf16>, vector<16x256xf32> -> vector<16x256xf32>
    %cst_8 = arith.constant 0.000000e+00 : f32
    %12 = vector.broadcast %cst_8 : f32 to vector<16x128xf32>
    %c0_9 = arith.constant 0 : index
    %c0_10 = arith.constant 0 : index
    %c0_11 = arith.constant 0 : index
    %13 = vector.load %arg4[%c0_9, %c0_10, %c0_11] : memref<2x128x768xbf16, #tpu.memory_space<vmem>>, vector<1x128x768xbf16>
    %14 = vector.shape_cast %13 : vector<1x128x768xbf16> to vector<128x768xbf16>
    %c0_12 = arith.constant 0 : index
    %c0_13 = arith.constant 0 : index
    %c0_14 = arith.constant 0 : index
    %15 = vector.load %arg5[%c0_12, %c0_13, %c0_14] : memref<2x768x128xbf16, #tpu.memory_space<vmem>>, vector<1x768x128xbf16>
    %16 = vector.shape_cast %15 : vector<1x768x128xbf16> to vector<768x128xbf16>
    %cst_15 = arith.constant dense<0.000000e+00> : vector<128x128xf32>
    %17 = tpu.matmul %14, %16, %cst_15 {dimension_numbers = #tpu.dot_dimension_numbers<[1], [0], [0], [1], [0, 0, 1, 1], [], []>} : vector<128x768xbf16>, vector<768x128xbf16>, vector<128x128xf32> -> vector<128x128xf32>
    %18 = vector.extract_strided_slice %11 {offsets = [0, 0], sizes = [16, 128], strides = [1, 1]} : vector<16x256xf32> to vector<16x128xf32>
    %19 = arith.truncf %18 : vector<16x128xf32> to vector<16x128xbf16>
    %20 = arith.truncf %17 : vector<128x128xf32> to vector<128x128xbf16>
    %cst_16 = arith.constant dense<0.000000e+00> : vector<16x128xf32>
    %21 = tpu.matmul %19, %20, %cst_16 {dimension_numbers = #tpu.dot_dimension_numbers<[1], [0], [0], [1], [0, 0, 1, 1], [], []>} : vector<16x128xbf16>, vector<128x128xbf16>, vector<16x128xf32> -> vector<16x128xf32>
    %22 = arith.addf %12, %21 : vector<16x128xf32>
    %c1 = arith.constant 1 : index
    %c0_17 = arith.constant 0 : index
    %c0_18 = arith.constant 0 : index
    %23 = vector.load %arg4[%c1, %c0_17, %c0_18] : memref<2x128x768xbf16, #tpu.memory_space<vmem>>, vector<1x128x768xbf16>
    %24 = vector.shape_cast %23 : vector<1x128x768xbf16> to vector<128x768xbf16>
    %c1_19 = arith.constant 1 : index
    %c0_20 = arith.constant 0 : index
    %c0_21 = arith.constant 0 : index
    %25 = vector.load %arg5[%c1_19, %c0_20, %c0_21] : memref<2x768x128xbf16, #tpu.memory_space<vmem>>, vector<1x768x128xbf16>
    %26 = vector.shape_cast %25 : vector<1x768x128xbf16> to vector<768x128xbf16>
    %cst_22 = arith.constant dense<0.000000e+00> : vector<128x128xf32>
    %27 = tpu.matmul %24, %26, %cst_22 {dimension_numbers = #tpu.dot_dimension_numbers<[1], [0], [0], [1], [0, 0, 1, 1], [], []>} : vector<128x768xbf16>, vector<768x128xbf16>, vector<128x128xf32> -> vector<128x128xf32>
    %28 = vector.extract_strided_slice %11 {offsets = [0, 128], sizes = [16, 128], strides = [1, 1]} : vector<16x256xf32> to vector<16x128xf32>
    %29 = arith.truncf %28 : vector<16x128xf32> to vector<16x128xbf16>
    %30 = arith.truncf %27 : vector<128x128xf32> to vector<128x128xbf16>
    %cst_23 = arith.constant dense<0.000000e+00> : vector<16x128xf32>
    %31 = tpu.matmul %29, %30, %cst_23 {dimension_numbers = #tpu.dot_dimension_numbers<[1], [0], [0], [1], [0, 0, 1, 1], [], []>} : vector<16x128xbf16>, vector<128x128xbf16>, vector<16x128xf32> -> vector<16x128xf32>
    %32 = arith.addf %22, %31 : vector<16x128xf32>
    %33 = vector.broadcast %9 : vector<16x1xf32> to vector<16x128xf32>
    %34 = arith.addf %32, %33 : vector<16x128xf32>
    %c0_24 = arith.constant 0 : index
    %c0_25 = arith.constant 0 : index
    %35 = vector.load %arg6[%c0_24, %c0_25] : memref<1x128xf32, #tpu.memory_space<vmem>>, vector<1x128xf32>
    %36 = vector.broadcast %35 : vector<1x128xf32> to vector<16x128xf32>
    %37 = arith.addf %34, %36 : vector<16x128xf32>
    %c0_26 = arith.constant 0 : index
    %c0_27 = arith.constant 0 : index
    %38 = vector.load %arg7[%c0_26, %c0_27] : memref<16x128xf32, #tpu.memory_space<vmem>>, vector<16x128xf32>
    tpu.vector_store %arg7[%c0_26, %c0_27], %37 {strides = array<i32>} : memref<16x128xf32, #tpu.memory_space<vmem>>, vector<16x128xf32>,
    return
  }
}

</mosaic_0001>

<bundles_post_ra>
// kernel: vquant_linear_forward.1
= control target key start
LH: loop header
LB: loop body
LE: loop exit
PB: predicated region body
PF: predicated region fallthrough
CT: control target
= control target key end

     0   :  { %12 = vsyncpa [#allocation3], 0  ;;  %s3862_s0 = inlined_call_operand.hbm [shape: f32[16,256], index: 0, kind: input, shape index: {}]   ;;  %s3863_s1 = inlined_call_operand.vmem [shape: f32[1,256], index: 1, kind: input, shape index: {}]   ;;  %s3864_s2 = inlined_call_operand.vmem [shape: f32[1,256], index: 2, kind: input, shape index: {}]   ;;  %s3865_s3 = inlined_call_operand.hbm [shape: bf16[256,256], index: 3, kind: input, shape index: {}]   ;;  %s3866_s4 = inlined_call_operand.hbm [shape: bf16[2,128,768], index: 4, kind: input, shape index: {}]   ;;  %s3867_s5 = inlined_call_operand.hbm [shape: bf16[2,768,128], index: 5, kind: input, shape index: {}]   ;;  %s3868_s6 = inlined_call_operand.vmem [shape: f32[1,128], index: 6, kind: input, shape index: {}]   ;;  %s3869_s7 = inlined_call_operand.hbm [shape: f32[16,128], index: 7, kind: output, shape index: {}]  }
   0x1   :  { %13 = vsyncpa [#allocation6], 0 }
   0x2   :  { %14 = vsyncpa [#allocation9], 0 }
   0x3   :  { %15 = vsyncpa [#allocation4], 0  ;;  %s3514_s24 = smov [#allocation5]   ;;  %s3396_s28 = scalar_lea.hbm %s3865_s3, 4096 }
   0x4   :  { %s37_s25 = sshll.u32 %s3514_s24, 4  ;;  %p3397_p0 = scmp.ne.s32.totalorder %s3865_s3, %s3396_s28  ;;  %s38_s25 = int_to_ptr.vmem [resolvable:$true] %s37_s25 }
   0x5   :  { %p3400_p1 = scmp.lt.u32.totalorder %s3396_s28, %s3865_s3 }
   0x7   :  { %p3402_p2 = pnand %p3400_p1, %p3397_p0 }
   0x9   :  { %3405 = shalt.err (!%p3402_p2)
}
   0xa   :  { %s3406_s10 = scalar_lea.vmem %s38_s25, 4096  ;;  %p3411_p4 = scmp.lt.s32.totalorder %s38_s25, %s38_s25 }
   0xb   :  { %p3407_p3 = scmp.ne.s32.totalorder %s38_s25, %s3406_s10  ;;  %p3412_p5 = scmp.lt.s32.totalorder %s3406_s10, %s3406_s10 }
   0xd   :  { %p3413_p6 = por %p3412_p5, %p3411_p4 }
   0xf   :  { %p3414_p7 = pnand %p3413_p6, %p3407_p3 }
  0x11   :  { %3417 = shalt.err (!%p3414_p7)
}
  0x12   :  { %s3515_s11 = smov 128   ;;  %s3516_s12 = smov 8  }
  0x13   :  { %43 = dma.hbm_to_vmem [thread:$0]  %s3865_s3, 4096, %s38_s25, [#allocation6], %s3515_s11, %s3515_s11, %s3516_s12  }
  0x14   :  { %s3517_s15 = smov [#allocation2]   ;;  %s3418_s19 = scalar_lea.hbm %s3862_s0, 512 }
  0x15   :  { %s21_s16 = sshll.u32 %s3517_s15, 4  ;;  %p3419_p8 = scmp.ne.s32.totalorder %s3862_s0, %s3418_s19  ;;  %s22_s16 = int_to_ptr.vmem [resolvable:$true] %s21_s16 }
  0x16   :  { %p3422_p9 = scmp.lt.u32.totalorder %s3418_s19, %s3862_s0 }
  0x18   :  { %p3424_p10 = pnand %p3422_p9, %p3419_p8 }
  0x1a   :  { %3427 = shalt.err (!%p3424_p10)
}
  0x1b   :  { %s3428_s24 = scalar_lea.vmem %s22_s16, 512  ;;  %p3433_p12 = scmp.lt.s32.totalorder %s22_s16, %s22_s16 }
  0x1c   :  { %p3429_p11 = scmp.ne.s32.totalorder %s22_s16, %s3428_s24  ;;  %p3434_p13 = scmp.lt.s32.totalorder %s3428_s24, %s3428_s24 }
  0x1e   :  { %p3435_p0 = por %p3434_p13, %p3433_p12 }
  0x20   :  { %p3436_p1 = pnand %p3435_p0, %p3429_p11 }
  0x22   :  { %3439 = shalt.err (!%p3436_p1)
}
  0x23   :  { %s3518_s3 = smov 256   ;;  %s3519_s25 = smov 16  }
  0x24   :  { %27 = dma.hbm_to_vmem [thread:$0]  %s3862_s0, 512, %s22_s16, [#allocation3], %s3518_s3, %s3518_s3, %s3519_s25  }
  0x25   :  { %s3520_s28 = smov [#allocation7]   ;;  %s3440_s9 = scalar_lea.hbm %s3866_s4, 12288 }
  0x26   :  { %s49_s29 = sshll.u32 %s3520_s28, 4  ;;  %p3441_p2 = scmp.ne.s32.totalorder %s3866_s4, %s3440_s9  ;;  %s50_s29 = int_to_ptr.vmem [resolvable:$true] %s49_s29 }
  0x27   :  { %p3444_p3 = scmp.lt.u32.totalorder %s3440_s9, %s3866_s4 }
  0x29   :  { %p3446_p4 = pnand %p3444_p3, %p3441_p2 }
  0x2b   :  { %3449 = shalt.err (!%p3446_p4)
}
  0x2c   :  { %s3450_s17 = scalar_lea.vmem %s50_s29, 12288  ;;  %p3455_p6 = scmp.lt.s32.totalorder %s50_s29, %s50_s29 }
  0x2d   :  { %p3451_p5 = scmp.ne.s32.totalorder %s50_s29, %s3450_s17  ;;  %p3456_p7 = scmp.lt.s32.totalorder %s3450_s17, %s3450_s17 }
  0x2f   :  { %p3457_p8 = por %p3456_p7, %p3455_p6 }
  0x31   :  { %p3458_p9 = pnand %p3457_p8, %p3451_p5 }
  0x33   :  { %3461 = shalt.err (!%p3458_p9)
}
  0x34   :  { %s3521_s0 = smov 384   ;;  %s3522_s16 = smov 24  }
  0x35   :  { %55 = dma.hbm_to_vmem [thread:$0]  %s3866_s4, 12288, %s50_s29, [#allocation6], %s3521_s0, %s3521_s0, %s3522_s16  }
  0x36   :  { %s3523_s20 = smov [#allocation8]   ;;  %s3462_s24 = scalar_lea.hbm %s3867_s5, 12288 }
  0x37   :  { %s61_s21 = sshll.u32 %s3523_s20, 4  ;;  %p3463_p10 = scmp.ne.s32.totalorder %s3867_s5, %s3462_s24  ;;  %s62_s21 = int_to_ptr.vmem [resolvable:$true] %s61_s21 }
  0x38   :  { %p3466_p11 = scmp.lt.u32.totalorder %s3462_s24, %s3867_s5 }
  0x3a   :  { %p3468_p12 = pnand %p3466_p11, %p3463_p10 }
  0x3c   :  { %3471 = shalt.err (!%p3468_p12)
}
  0x3d   :  { %s3472_s28 = scalar_lea.vmem %s62_s21, 12288  ;;  %p3477_p0 = scmp.lt.s32.totalorder %s62_s21, %s62_s21 }
  0x3e   :  { %p3473_p13 = scmp.ne.s32.totalorder %s62_s21, %s3472_s28  ;;  %p3478_p1 = scmp.lt.s32.totalorder %s3472_s28, %s3472_s28 }
  0x40   :  { %p3479_p2 = por %p3478_p1, %p3477_p0 }
  0x42   :  { %p3480_p3 = pnand %p3479_p2, %p3473_p13 }
  0x44   :  { %3483 = shalt.err (!%p3480_p3)
}
  0x45   :  { %s3524_s4 = smov 64   ;;  %s3525_s29 = smov 4  }
  0x46   :  { %67 = dma.hbm_to_vmem [thread:$0]  %s3867_s5, 12288, %s62_s21, [#allocation9], %s3524_s4, %s3524_s4, %s3525_s29  }
  0x47   :  { %3506 = dma.done.wait [#allocation3], 512  }
  0x48   :  { %3507 = vsyncadd [#allocation3], 4294966784 }
  0x49   :  { %3508 = dma.done.wait [#allocation6], 16384  }
  0x4a   :  { %3509 = vsyncadd [#allocation6], 4294950912 }
  0x4b   :  { %3510 = dma.done.wait [#allocation9], 12288  }
  0x4c   :  { %3511 = vsyncadd [#allocation9], 4294955008  ;;  %v3104_v0 = vld [vmem:[#allocation5 + $0x4] ss:$8 sps:$4 sm:$0xff]   ;;  %v3107_v2 = vld [vmem:[#allocation5] ss:$8 sps:$4 sm:$0xff]   ;;  %v89_v37 = vlaneseq }
  0x4d   :  { %v3106_v1 = vld [vmem:[#allocation8 + $0x40] sm:$0xff]   ;;  %319 = vmatprep.subr.bf16.mxu0 %v3104_v0  ;;  %v3109_v4 = vld [vmem:[#allocation5 + $0x14] ss:$8 sps:$4 sm:$0xff]   ;;  %v3111_v5 = vld [vmem:[#allocation8 + $0x48] sm:$0xff]   ;;  %vm3527_vm0 = vmmov 0   ;;  %s3528_s14 = smov [#allocation10]  }
  0x4e   :  { %2647 = vmatprep.subr.bf16.mxu1 %v3106_v1  ;;  %v3108_v3 = vld [vmem:[#allocation8] sm:$0xff]   ;;  %320 = vmatpush1.bf16.msra.mxu0 %v3107_v2  ;;  %v3112_v6 = vld [vmem:[#allocation5 + $0x10] ss:$8 sps:$4 sm:$0xff]   ;;  %v3113_v7 = vld [vmem:[#allocation8 + $0x8] sm:$0xff]   ;;  %v3620_v40 = vshrl.u32 %v89_v37, 7  ;;  %s2408_s15 = sshll.u32 %s3528_s14, 4  ;;  %s2409_s15 = int_to_ptr.vmem [resolvable:$true] %s2408_s15 }
  0x4f   :  { %2648 = vmatpush3.bf16.msra.mxu1 %v3108_v3  ;;  %321 = vmatprep.subr.bf16.mxu0 %v3109_v4  ;;  %v3114_v8 = vld [vmem:[#allocation5 + $0x24] ss:$8 sps:$4 sm:$0xff]   ;;  %v3116_v9 = vld [vmem:[#allocation8 + $0x50] sm:$0xff]   ;;  %v3117_v10 = vld [vmem:[#allocation5 + $0x20] ss:$8 sps:$4 sm:$0xff]   ;;  %s3484_s17 = scalar_lea.vmem %s2409_s15, 256  ;;  %p3489_p5 = scmp.lt.s32.totalorder %s2409_s15, %s2409_s15 }
  0x50   :  { %2649 = vmatprep.subr.bf16.mxu1 %v3111_v5  ;;  %v3118_v11 = vld [vmem:[#allocation8 + $0x10] sm:$0xff]   ;;  %v3121_v13 = vld [vmem:[#allocation8 + $0x58] sm:$0xff]   ;;  %v3124_v16 = vld [vmem:[#allocation5 + $0x44] ss:$8 sps:$4 sm:$0xff]   ;;  %v95_v45 = vsub.s32 1, %v3620_v40  ;;  %v91_v63 = vsub.s32 0, %v3620_v40  ;;  %p3485_p4 = scmp.ne.s32.totalorder %s2409_s15, %s3484_s17  ;;  %p3490_p6 = scmp.lt.s32.totalorder %s3484_s17, %s3484_s17 }
  0x51   :  { %v3119_v12 = vld [vmem:[#allocation5 + $0x34] ss:$8 sps:$4 sm:$0xff]   ;;  %v3122_v14 = vld [vmem:[#allocation5 + $0x30] ss:$8 sps:$4 sm:$0xff]   ;;  %v3126_v17 = vld [vmem:[#allocation8 + $0x60] sm:$0xff]  }
  0x52   :  { %322 = vmatpush1.bf16.msra.mxu0 %v3112_v6  ;;  %v3123_v15 = vld [vmem:[#allocation8 + $0x18] sm:$0xff]   ;;  %v3127_v18 = vld [vmem:[#allocation5 + $0x40] ss:$8 sps:$4 sm:$0xff]   ;;  %v3134_v24 = vld [vmem:[#allocation5 + $0x64] ss:$8 sps:$4 sm:$0xff]   ;;  %p3491_p7 = por %p3490_p6, %p3489_p5 }
  0x53   :  { %2650 = vmatpush3.bf16.msra.mxu1 %v3113_v7  ;;  %323 = vmatprep.subr.bf16.mxu0 %v3114_v8  ;;  %v3128_v19 = vld [vmem:[#allocation8 + $0x20] sm:$0xff]   ;;  %v3129_v20 = vld [vmem:[#allocation5 + $0x54] ss:$8 sps:$4 sm:$0xff]   ;;  %v3131_v21 = vld [vmem:[#allocation8 + $0x68] sm:$0xff]  }
  0x54   :  { %2651 = vmatprep.subr.bf16.mxu1 %v3116_v9  ;;  %v3132_v22 = vld [vmem:[#allocation5 + $0x50] ss:$8 sps:$4 sm:$0xff]   ;;  %v3133_v23 = vld [vmem:[#allocation8 + $0x28] sm:$0xff]   ;;  %v3139_v28 = vld [vmem:[#allocation5 + $0x74] ss:$8 sps:$4 sm:$0xff]   ;;  %p3492_p8 = pnand %p3491_p7, %p3485_p4 }
  0x55   :  { %v3136_v25 = vld [vmem:[#allocation8 + $0x70] sm:$0xff]   ;;  %v3137_v26 = vld [vmem:[#allocation5 + $0x60] ss:$8 sps:$4 sm:$0xff]   ;;  %v3141_v29 = vld [vmem:[#allocation8 + $0x78] sm:$0xff]  }
  0x56   :  { %324 = vmatpush1.bf16.msra.mxu0 %v3117_v10  ;;  %v3138_v27 = vld [vmem:[#allocation8 + $0x30] sm:$0xff]   ;;  %v3146_v31 = vld [vmem:[#allocation7 + $0x4] ss:$24 sps:$4 sm:$0xff]   ;;  %v3144_v34 = vld [vmem:[#allocation7] ss:$24 sps:$4 sm:$0xff]  }
  0x57   :  { %2652 = vmatpush3.bf16.msra.mxu1 %v3118_v11  ;;  %325 = vmatprep.subr.bf16.mxu0 %v3119_v12  ;;  %v3142_v30 = vld [vmem:[#allocation5 + $0x70] ss:$8 sps:$4 sm:$0xff]   ;;  %v3147_v33 = vld [vmem:[#allocation5 + $0x84] ss:$8 sps:$4 sm:$0xff]   ;;  %v3149_v35 = vld [vmem:[#allocation5 + $0x80] ss:$8 sps:$4 sm:$0xff]  }
  0x58   :  { %2653 = vmatprep.subr.bf16.mxu1 %v3121_v13  ;;  %v3143_v32 = vld [vmem:[#allocation8 + $0x38] sm:$0xff]   ;;  %1066 = vmatprep.mubr.bf16.mxu1 %v3146_v31  ;;  %v3153_v38 = vld [vmem:[#allocation7 + $0x34] ss:$24 sps:$4 sm:$0xff]   ;;  %v3157_v42 = vld [vmem:[#allocation7 + $0x30] ss:$24 sps:$4 sm:$0xff]  }
  0x59   :  { %v3150_v36 = vld [vmem:[#allocation5 + $0x94] ss:$8 sps:$4 sm:$0xff]   ;;  %v3152_v39 = vld [vmem:[#allocation5 + $0x90] ss:$8 sps:$4 sm:$0xff]   ;;  %v3155_v41 = vld [vmem:[#allocation5 + $0xa4] ss:$8 sps:$4 sm:$0xff]  }
  0x5a   :  { %326 = vmatpush1.bf16.msra.mxu0 %v3122_v14  ;;  %v3158_v43 = vld [vmem:[#allocation5 + $0xa0] ss:$8 sps:$4 sm:$0xff]   ;;  %v3159_v44 = vld [vmem:[#allocation5 + $0xb4] ss:$8 sps:$4 sm:$0xff]   ;;  %v3161_v50 = vld [vmem:[#allocation5 + $0xb0] ss:$8 sps:$4 sm:$0xff]  }
  0x5b   :  { %2654 = vmatpush3.bf16.msra.mxu1 %v3123_v15  ;;  %327 = vmatprep.subr.bf16.mxu0 %v3124_v16  ;;  %v3162_v46 = vld [vmem:[#allocation7 + $0x64] ss:$24 sps:$4 sm:$0xff]   ;;  %v84_v47 = vld [vmem:[#allocation2 + $0x8] sm:$0xff]  ;;  %v87_v49 = vld [vmem:[%s3863_s1] sm:$0x3] }
  0x5c   :  { %2655 = vmatprep.subr.bf16.mxu1 %v3126_v17  ;;  %v86_v48 = vld [vmem:[#allocation2 + $0x18] sm:$0xff]  ;;  %v96_v51 = vrot.slane %v87_v49, %v95_v45  ;;  %v3164_v52 = vld [vmem:[#allocation5 + $0xc4] ss:$8 sps:$4 sm:$0xff]   ;;  %v3167_v54 = vld [vmem:[#allocation5 + $0xc0] ss:$8 sps:$4 sm:$0xff]   ;;  %v92_v7 = vrot.slane %v87_v49, %v91_v63 }
  0x5d   :  { %v3166_v53 = vld [vmem:[#allocation7 + $0x60] ss:$24 sps:$4 sm:$0xff]   ;;  %v3168_v57 = vld [vmem:[#allocation5 + $0xd4] ss:$8 sps:$4 sm:$0xff]   ;;  %v3188_v0 = vld [vmem:[#allocation8 + $0x148] sm:$0xff]  }
  0x5e   :  { %328 = vmatpush1.bf16.msra.mxu0 %v3127_v18  ;;  %v100_v55 = vmul.f32 %v96_v51, %v84_v47  ;;  %v102_v56 = vmul.f32 %v96_v51, %v86_v48  ;;  %v3184_v58 = vld [vmem:[#allocation8 + $0x140] sm:$0xff]   ;;  %v3171_v59 = vld [vmem:[#allocation7 + $0x94] ss:$24 sps:$4 sm:$0xff]   ;;  %v3170_v62 = vld [vmem:[#allocation5 + $0xd0] ss:$8 sps:$4 sm:$0xff]  }
  0x5f   :  { %2656 = vmatpush3.bf16.msra.mxu1 %v3128_v19  ;;  %329 = vmatprep.subr.bf16.mxu0 %v3129_v20  ;;  %v3186_v61 = vld [vmem:[#allocation8 + $0x100] sm:$0xff]   ;;  %v3190_v2 = vld [vmem:[#allocation8 + $0x108] sm:$0xff]   ;;  %v3177_v6 = vld [vmem:[#allocation5 + $0xf4] ss:$8 sps:$4 sm:$0xff]  }
  0x60   :  { %2657 = vmatprep.subr.bf16.mxu1 %v3131_v21  ;;  %v104_v60 = vpack.c.bf16 %v102_v56, %v100_v55  ;;  %v3173_v1 = vld [vmem:[#allocation5 + $0xe4] ss:$8 sps:$4 sm:$0xff]   ;;  %v3175_v3 = vld [vmem:[#allocation7 + $0x90] ss:$24 sps:$4 sm:$0xff]   ;;  %v3199_v15 = vld [vmem:[#allocation8 + $0x158] sm:$0xff]  }
  0x61   :  { %v3176_v4 = vld [vmem:[#allocation5 + $0xe0] ss:$8 sps:$4 sm:$0xff]   ;;  %v85_v8 = vld [vmem:[#allocation2 + $0x10] sm:$0xff]  ;;  %v3180_v10 = vld [vmem:[#allocation7 + $0xc4] ss:$24 sps:$4 sm:$0xff]  }
  0x62   :  { %330 = vmatpush1.bf16.msra.mxu0 %v3132_v22  ;;  %351 = vmatprep.mubr.bf16.mxu0 %v104_v60  ;;  %v83_v5 = vld [vmem:[#allocation2] sm:$0xff]  ;;  %v3195_v9 = vld [vmem:[#allocation8 + $0x150] sm:$0xff]   ;;  %v101_v14 = vmul.f32 %v92_v7, %v85_v8  ;;  %v3201_v18 = vld [vmem:[#allocation8 + $0x118] sm:$0xff]  }
  0x63   :  { %2658 = vmatpush3.bf16.msra.mxu1 %v3133_v23  ;;  %331 = vmatprep.subr.bf16.mxu0 %v3134_v24  ;;  %v3197_v11 = vld [vmem:[#allocation8 + $0x110] sm:$0xff]   ;;  %v99_v13 = vmul.f32 %v92_v7, %v83_v5  ;;  %v3183_v16 = vld [vmem:[#allocation8 + $0xc0] sm:$0xff]   ;;  %v3187_v21 = vld [vmem:[#allocation8 + $0xc8] sm:$0xff]  }
  0x64   :  { %2659 = vmatprep.subr.bf16.mxu1 %v3136_v25  ;;  %v3179_v12 = vld [vmem:[#allocation5 + $0xf0] ss:$8 sps:$4 sm:$0xff]   ;;  %v3185_v20 = vld [vmem:[#allocation8 + $0x80] sm:$0xff]   ;;  %v3191_v22 = vld [vmem:[#allocation7 + $0xf4] ss:$24 sps:$4 sm:$0xff]  }
  0x65   :  { %v3182_v17 = vld [vmem:[#allocation7 + $0xc0] ss:$24 sps:$4 sm:$0xff]   ;;  %v103_v19 = vpack.c.bf16 %v101_v14, %v99_v13  ;;  %v3189_v24 = vld [vmem:[#allocation8 + $0x88] sm:$0xff]   ;;  %v3216_v47 = vld [vmem:[#allocation8 + $0xf0] sm:$0xff]  }
  0x66   :  { %332 = vmatpush1.bf16.msra.mxu0 %v3137_v26  ;;  %v3206_v23 = vld [vmem:[#allocation8 + $0x160] sm:$0xff]   ;;  %v3194_v26 = vld [vmem:[#allocation8 + $0xd0] sm:$0xff]   ;;  %v3198_v31 = vld [vmem:[#allocation8 + $0xd8] sm:$0xff]  }
  0x67   :  { %2660 = vmatpush3.bf16.msra.mxu1 %v3138_v27  ;;  %333 = vmatprep.subr.bf16.mxu0 %v3139_v28  ;;  %v3208_v25 = vld [vmem:[#allocation8 + $0x120] sm:$0xff]   ;;  %v3193_v27 = vld [vmem:[#allocation7 + $0xf0] ss:$24 sps:$4 sm:$0xff]   ;;  %v3229_v51 = vld [vmem:[#allocation7 + $0x14] ss:$24 sps:$4 sm:$0xff]  }
  0x68   :  { %2661 = vmatprep.subr.bf16.mxu1 %v3141_v29  ;;  %v3210_v28 = vld [vmem:[#allocation8 + $0x168] sm:$0xff]   ;;  %v3196_v29 = vld [vmem:[#allocation8 + $0x90] sm:$0xff]   ;;  %v3204_v37 = vld [vmem:[#allocation7 + $0x120] ss:$24 sps:$4 sm:$0xff]  }
  0x69   :  { %v3215_v48 = vld [vmem:[#allocation7 + $0x150] ss:$24 sps:$4 sm:$0xff]   ;;  %v3231_v56 = vld [vmem:[#allocation8 + $0x180] sm:$0xff]  }
  0x6a   :  { %334 = vmatpush1.bf16.msra.mxu0 %v3142_v30  ;;  %v3212_v30 = vld [vmem:[#allocation8 + $0x128] sm:$0xff]   ;;  %v3218_v49 = vld [vmem:[#allocation8 + $0xb0] sm:$0xff]   ;;  %v3264_v13 = vld [vmem:[#allocation8 + $0x1e0] sm:$0xff]  }
  0x6b   :  { %2662 = vmatpush3.bf16.msra.mxu1 %v3143_v32  ;;  %335 = vmatprep.subr.bf16.mxu0 %v3147_v33  ;;  %v3202_v32 = vld [vmem:[#allocation7 + $0x124] ss:$24 sps:$4 sm:$0xff]   ;;  %v3227_v55 = vld [vmem:[#allocation7 + $0x10] ss:$24 sps:$4 sm:$0xff]  }
  0x6c   :  { %2775 = vmatprep.subr.bf16.mxu1 %v3184_v58  ;;  %v3200_v33 = vld [vmem:[#allocation8 + $0x98] sm:$0xff]   ;;  %v3239_v60 = vld [vmem:[#allocation8 + $0x188] sm:$0xff]   ;;  %v3247_v5 = vld [vmem:[#allocation8 + $0x190] sm:$0xff]  }
  0x6d   :  { %v3234_v58 = vld [vmem:[#allocation7 + $0x44] ss:$24 sps:$4 sm:$0xff]   ;;  %v3266_v7 = vld [vmem:[#allocation8 + $0x248] sm:$0xff]  }
  0x6e   :  { %1067 = vmatmul.mubr.bf16.vlgmr.msra.gmra.mrb[0].mxu1 %v3144_v34  ;;  %336 = vmatpush1.bf16.msra.mxu0 %v3149_v35  ;;  %v3217_v34 = vld [vmem:[#allocation8 + $0x170] sm:$0xff]   ;;  %v3205_v35 = vld [vmem:[#allocation8 + $0xe0] sm:$0xff]   ;;  %v3267_v8 = vld [vmem:[#allocation8 + $0x208] sm:$0xff]  }
  0x6f   :  { %337 = vmatprep.subr.bf16.mxu0 %v3150_v36  ;;  %1074 = vmatprep.mubr.bf16.mxu1 %v3153_v38  ;;  %v3219_v36 = vld [vmem:[#allocation8 + $0x130] sm:$0xff]   ;;  %v3207_v38 = vld [vmem:[#allocation8 + $0xa0] sm:$0xff]  }
  0x70   :  { %2776 = vmatpush3.bf16.msra.mxu1 %v3186_v61  ;;  %v3246_v61 = vld [vmem:[#allocation8 + $0x1d0] sm:$0xff]   ;;  %v3250_v14 = vld [vmem:[#allocation7 + $0xa4] ss:$24 sps:$4 sm:$0xff]  }
  0x71   :  { %2777 = vmatprep.subr.bf16.mxu1 %v3188_v0  ;;  %v3237_v0 = vld [vmem:[#allocation7 + $0x40] ss:$24 sps:$4 sm:$0xff]  }
  0x72   :  { %338 = vmatpush1.bf16.msra.mxu0 %v3152_v39  ;;  %v3209_v39 = vld [vmem:[#allocation8 + $0xe8] sm:$0xff]  }
  0x73   :  { %339 = vmatprep.subr.bf16.mxu0 %v3155_v41  ;;  %v3221_v41 = vld [vmem:[#allocation8 + $0x178] sm:$0xff]  }
  0x74   :  { %2778 = vmatpush3.bf16.msra.mxu1 %v3190_v2  ;;  %v3242_v2 = vld [vmem:[#allocation7 + $0x74] ss:$24 sps:$4 sm:$0xff]  }
  0x75   :  { %2779 = vmatprep.subr.bf16.mxu1 %v3195_v9  ;;  %v3244_v9 = vld [vmem:[#allocation7 + $0x68] ss:$24 sps:$4 sm:$0xff]  }
  0x76   :  { %1075 = vmatmul.mubr.bf16.gmra.mrb[4].mxu1 %v3157_v42  ;;  %340 = vmatpush1.bf16.msra.mxu0 %v3158_v43  ;;  %v3213_v42 = vld [vmem:[#allocation7 + $0x154] ss:$24 sps:$4 sm:$0xff]   ;;  %v3223_v43 = vld [vmem:[#allocation8 + $0x138] sm:$0xff]  }
  0x77   :  { %341 = vmatprep.subr.bf16.mxu0 %v3159_v44  ;;  %1082 = vmatprep.mubr.bf16.mxu1 %v3162_v46  ;;  %v3226_v44 = vld [vmem:[#allocation7 + $0xc] ss:$24 sps:$4 sm:$0xff]  }
  0x78   :  { %2780 = vmatpush3.bf16.msra.mxu1 %v3197_v11  ;;  %v3211_v46 = vld [vmem:[#allocation8 + $0xa8] sm:$0xff]  }
  0x79   :  { %2781 = vmatprep.subr.bf16.mxu1 %v3199_v15  ;;  %v3245_v11 = vld [vmem:[#allocation7 + $0x70] ss:$24 sps:$4 sm:$0xff]   ;;  %v3265_v15 = vld [vmem:[#allocation8 + $0x1a0] sm:$0xff]  }
  0x7a   :  { %342 = vmatpush1.bf16.msra.mxu0 %v3161_v50  ;;  %v3220_v50 = vld [vmem:[#allocation8 + $0xf8] sm:$0xff]  }
  0x7b   :  { %343 = vmatprep.subr.bf16.mxu0 %v3164_v52  ;;  %v3222_v52 = vld [vmem:[#allocation8 + $0xb8] sm:$0xff]  }
  0x7c   :  { %2782 = vmatpush3.bf16.msra.mxu1 %v3201_v18  ;;  %v3276_v18 = vld [vmem:[#allocation8 + $0x1e8] sm:$0xff]  }
  0x7d   :  { %2783 = vmatprep.subr.bf16.mxu1 %v3206_v23  ;;  %v3253_v23 = vld [vmem:[#allocation7 + $0xa0] ss:$24 sps:$4 sm:$0xff]  }
  0x7e   :  { %1083 = vmatmul.mubr.bf16.gmra.mrb[8].mxu1 %v3166_v53  ;;  %344 = vmatpush1.bf16.msra.mxu0 %v3167_v54  ;;  %v3230_v53 = vld [vmem:[#allocation8 + $0x1c0] sm:$0xff]  }
  0x7f   :  { %345 = vmatprep.subr.bf16.mxu0 %v3168_v57  ;;  %1090 = vmatprep.mubr.bf16.mxu1 %v3171_v59  ;;  %v3224_v54 = vld [vmem:[#allocation7 + $0x8] ss:$24 sps:$4 sm:$0xff]   ;;  %v3232_v57 = vld [vmem:[#allocation7 + $0x3c] ss:$24 sps:$4 sm:$0xff]  }
  0x80   :  { %2784 = vmatpush3.bf16.msra.mxu1 %v3208_v25  ;;  %v3238_v59 = vld [vmem:[#allocation8 + $0x1c8] sm:$0xff]  }
  0x81   :  { %2785 = vmatprep.subr.bf16.mxu1 %v3210_v28  ;;  %v3258_v25 = vld [vmem:[#allocation7 + $0xd4] ss:$24 sps:$4 sm:$0xff]  }
  0x82   :  { %346 = vmatpush1.bf16.msra.mxu0 %v3170_v62  ;;  %v3236_v62 = vld [vmem:[#allocation7 + $0x38] ss:$24 sps:$4 sm:$0xff]  }
  0x83   :  { %347 = vmatprep.subr.bf16.mxu0 %v3173_v1  ;;  %v3240_v1 = vld [vmem:[#allocation7 + $0x6c] ss:$24 sps:$4 sm:$0xff]   ;;  %v3288_v28 = vld [vmem:[#allocation8 + $0x1f0] sm:$0xff]  }
  0x84   :  { %2786 = vmatpush3.bf16.msra.mxu1 %v3212_v30  ;;  %v3290_v30 = vld [vmem:[#allocation8 + $0x268] sm:$0xff]  }
  0x85   :  { %2787 = vmatprep.subr.bf16.mxu1 %v3217_v34  ;;  %v3268_v34 = vld [vmem:[#allocation7 + $0xfc] ss:$24 sps:$4 sm:$0xff]  }
  0x86   :  { %1091 = vmatmul.mubr.bf16.gmra.mrb[12].mxu1 %v3175_v3  ;;  %348 = vmatpush1.bf16.msra.mxu0 %v3176_v4  ;;  %v3262_v3 = vld [vmem:[#allocation8 + $0x240] sm:$0xff]  }
  0x87   :  { %349 = vmatprep.subr.bf16.mxu0 %v3177_v6  ;;  %1098 = vmatprep.mubr.bf16.mxu1 %v3180_v10  ;;  %v3263_v4 = vld [vmem:[#allocation8 + $0x200] sm:$0xff]   ;;  %v3254_v6 = vld [vmem:[#allocation8 + $0x1d8] sm:$0xff]  }
  0x88   :  { %2788 = vmatpush3.bf16.msra.mxu1 %v3219_v36  ;;  %v3255_v10 = vld [vmem:[#allocation8 + $0x198] sm:$0xff]   ;;  %v3298_v36 = vld [vmem:[#allocation8 + $0x270] sm:$0xff]  }
  0x89   :  { %2789 = vmatprep.subr.bf16.mxu1 %v3221_v41  ;;  %v3272_v41 = vld [vmem:[#allocation7 + $0xf8] ss:$24 sps:$4 sm:$0xff]  }
  0x8a   :  { %350 = vmatpush1.bf16.msra.mxu0 %v3179_v12  ;;  %v3248_v12 = vld [vmem:[#allocation7 + $0x9c] ss:$24 sps:$4 sm:$0xff]  }
  0x8b   :  { %2711 = vmatprep.subr.bf16.mxu0 %v3183_v16  ;;  %v3274_v16 = vld [vmem:[#allocation8 + $0x250] sm:$0xff]  }
  0x8c   :  { %2790 = vmatpush3.bf16.msra.mxu1 %v3223_v43  ;;  %v3303_v43 = vld [vmem:[#allocation8 + $0x238] sm:$0xff]  }
  0x8d   :  { %352 = vmatmul.mubr.bf16.vlgmr.msra.gmra.mrb[0].mxu0 %v103_v19  ;;  %2903 = vmatprep.subr.bf16.mxu1 %v3262_v3  ;;  %v3277_v19 = vld [vmem:[#allocation8 + $0x1a8] sm:$0xff]   ;;  %v3317_v3 = vld [vmem:[#allocation7 + $0x1b8] ss:$24 sps:$4 sm:$0xff]  }
  0x8e   :  { %1099 = vmatmul.mubr.bf16.gmra.mrb[16].mxu1 %v3182_v17  ;;  %2712 = vmatpush3.bf16.msra.mxu0 %v3185_v20  ;;  %v3275_v17 = vld [vmem:[#allocation8 + $0x210] sm:$0xff]   ;;  %v3278_v20 = vld [vmem:[#allocation8 + $0x258] sm:$0xff]  }
  0x8f   :  { %2713 = vmatprep.subr.bf16.mxu0 %v3187_v21  ;;  %1106 = vmatprep.mubr.bf16.mxu1 %v3191_v22  ;;  %v3279_v21 = vld [vmem:[#allocation8 + $0x218] sm:$0xff]  }
  0x90   :  { %1163 = vmatprep.mubr.bf16.mxu0 %v3226_v44  ;;  %v3252_v22 = vld [vmem:[#allocation7 + $0x98] ss:$24 sps:$4 sm:$0xff]  }
  0x91   :  { %v3273_v44 = vld [vmem:[#allocation7 + $0x100] ss:$24 sps:$4 sm:$0xff]  }
  0x92   :  { %2714 = vmatpush3.bf16.msra.mxu0 %v3189_v24  ;;  %v3256_v24 = vld [vmem:[#allocation7 + $0xcc] ss:$24 sps:$4 sm:$0xff]  }
  0x93   :  { %2715 = vmatprep.subr.bf16.mxu0 %v3194_v26  ;;  %v3286_v26 = vld [vmem:[#allocation8 + $0x260] sm:$0xff]  }
  0x96   :  { %1107 = vmatmul.mubr.bf16.gmra.mrb[20].mxu1 %v3193_v27  ;;  %2716 = vmatpush3.bf16.msra.mxu0 %v3196_v29  ;;  %v3287_v27 = vld [vmem:[#allocation8 + $0x220] sm:$0xff]   ;;  %v3289_v29 = vld [vmem:[#allocation8 + $0x1b0] sm:$0xff]  }
  0x97   :  { %2717 = vmatprep.subr.bf16.mxu0 %v3198_v31  ;;  %1114 = vmatprep.mubr.bf16.mxu1 %v3202_v32  ;;  %v3291_v31 = vld [vmem:[#allocation8 + $0x228] sm:$0xff]  }
  0x98   :  { %v3260_v32 = vld [vmem:[#allocation7 + $0xc8] ss:$24 sps:$4 sm:$0xff]  }
  0x9a   :  { %2718 = vmatpush3.bf16.msra.mxu0 %v3200_v33  ;;  %v3261_v33 = vld [vmem:[#allocation7 + $0xd0] ss:$24 sps:$4 sm:$0xff]  }
  0x9b   :  { %2719 = vmatprep.subr.bf16.mxu0 %v3205_v35  ;;  %v3270_v35 = vld [vmem:[#allocation7 + $0x104] ss:$24 sps:$4 sm:$0xff]  }
  0x9e   :  { %1115 = vmatmul.mubr.bf16.gmra.mrb[24].mxu1 %v3204_v37  ;;  %2720 = vmatpush3.bf16.msra.mxu0 %v3207_v38  ;;  %v3299_v37 = vld [vmem:[#allocation8 + $0x230] sm:$0xff]   ;;  %v3300_v38 = vld [vmem:[#allocation8 + $0x1f8] sm:$0xff]  }
  0x9f   :  { %2721 = vmatprep.subr.bf16.mxu0 %v3209_v39  ;;  %1122 = vmatprep.mubr.bf16.mxu1 %v3213_v42  ;;  %v3301_v39 = vld [vmem:[#allocation8 + $0x1b8] sm:$0xff]  }
  0xa0   :  { %v3302_v42 = vld [vmem:[#allocation8 + $0x278] sm:$0xff]  }
  0xa2   :  { %2722 = vmatpush3.bf16.msra.mxu0 %v3211_v46  ;;  %v3280_v46 = vld [vmem:[#allocation7 + $0x12c] ss:$24 sps:$4 sm:$0xff]  }
  0xa3   :  { %2723 = vmatprep.subr.bf16.mxu0 %v3216_v47  ;;  %v3282_v47 = vld [vmem:[#allocation7 + $0x134] ss:$24 sps:$4 sm:$0xff]  }
  0xa6   :  { %1123 = vmatmul.mubr.bf16.gmra.mrb[28].mxu1 %v3215_v48  ;;  %2724 = vmatpush3.bf16.msra.mxu0 %v3218_v49  ;;  %v3310_v48 = vld [vmem:[#allocation8 + $0x2c0] sm:$0xff]  }
  0xa7   :  { %2725 = vmatprep.subr.bf16.mxu0 %v3220_v50  ;;  %1260 = vmatprep.mubr.bf16.mxu1 %v3229_v51  ;;  %v3284_v49 = vld [vmem:[#allocation7 + $0x128] ss:$24 sps:$4 sm:$0xff]   ;;  %v3292_v51 = vld [vmem:[#allocation7 + $0x15c] ss:$24 sps:$4 sm:$0xff]  }
  0xa8   :  { %v3285_v50 = vld [vmem:[#allocation7 + $0x130] ss:$24 sps:$4 sm:$0xff]  }
  0xaa   :  { %2726 = vmatpush3.bf16.msra.mxu0 %v3222_v52  ;;  %v3294_v52 = vld [vmem:[#allocation7 + $0x164] ss:$24 sps:$4 sm:$0xff]  }
  0xab   :  { %2839 = vmatprep.subr.bf16.mxu0 %v3230_v53  ;;  %v3296_v53 = vld [vmem:[#allocation7 + $0x158] ss:$24 sps:$4 sm:$0xff]  }
  0xad   :  { %1164 = vmatmul.mubr.bf16.vlgmr.msra.gmra.mrb[4].mxu0 %v3224_v54  ;;  %v3297_v54 = vld [vmem:[#allocation7 + $0x160] ss:$24 sps:$4 sm:$0xff]  }
  0xae   :  { %1261 = vmatmul.mubr.bf16.vlgmr.msra.gmra.mrb[32].mxu1 %v3227_v55  ;;  %2840 = vmatpush3.bf16.msra.mxu0 %v3231_v56  ;;  %v3306_v55 = vld [vmem:[#allocation7 + $0x184] ss:$24 sps:$4 sm:$0xff]  }
  0xaf   :  { %1171 = vmatprep.mubr.bf16.mxu0 %v3232_v57  ;;  %1268 = vmatprep.mubr.bf16.mxu1 %v3234_v58  ;;  %v3309_v56 = vld [vmem:[#allocation7 + $0x18c] ss:$24 sps:$4 sm:$0xff]   ;;  %v3304_v57 = vld [vmem:[#allocation7 + $0x180] ss:$24 sps:$4 sm:$0xff]  }
  0xb0   :  { %2841 = vmatprep.subr.bf16.mxu0 %v3238_v59  ;;  %2904 = vmatpush3.bf16.msra.mxu1 %v3263_v4  ;;  %v3307_v58 = vld [vmem:[#allocation7 + $0x188] ss:$24 sps:$4 sm:$0xff]   ;;  %v3320_v4 = vld [vmem:[#allocation7 + $0x1e4] ss:$24 sps:$4 sm:$0xff]  }
  0xb1   :  { %2905 = vmatprep.subr.bf16.mxu1 %v3266_v7  ;;  %v3311_v59 = vld [vmem:[#allocation8 + $0x280] sm:$0xff]   ;;  %v3334_v7 = vld [vmem:[#allocation8 + $0x2d8] sm:$0xff]  }
  0xb2   :  { %2842 = vmatpush3.bf16.msra.mxu0 %v3239_v60  ;;  %v3312_v60 = vld [vmem:[#allocation7 + $0x1b4] ss:$24 sps:$4 sm:$0xff]  }
  0xb3   :  { %2843 = vmatprep.subr.bf16.mxu0 %v3246_v61  ;;  %v3314_v61 = vld [vmem:[#allocation7 + $0x1bc] ss:$24 sps:$4 sm:$0xff]  }
  0xb4   :  { %2906 = vmatpush3.bf16.msra.mxu1 %v3267_v8  ;;  %v3335_v8 = vld [vmem:[#allocation8 + $0x298] sm:$0xff]  }
  0xb5   :  { %1172 = vmatmul.mubr.bf16.gmra.mrb[8].mxu0 %v3236_v62  ;;  %2907 = vmatprep.subr.bf16.mxu1 %v3274_v16  ;;  %v3318_v62 = vld [vmem:[#allocation8 + $0x2c8] sm:$0xff]  }
  0xb6   :  { %1269 = vmatmul.mubr.bf16.gmra.mrb[36].mxu1 %v3237_v0  ;;  %1179 = vmatprep.mubr.bf16.mxu0 %v3240_v1  ;;  %v3319_v0 = vld [vmem:[#allocation8 + $0x288] sm:$0xff]   ;;  %v3326_v1 = vld [vmem:[#allocation8 + $0x2d0] sm:$0xff]  }
  0xb7   :  { %1276 = vmatprep.mubr.bf16.mxu1 %v3242_v2  ;;  %2844 = vmatpush3.bf16.msra.mxu0 %v3247_v5  ;;  %v3316_v2 = vld [vmem:[#allocation7 + $0x1b0] ss:$24 sps:$4 sm:$0xff]   ;;  %v3322_v5 = vld [vmem:[#allocation7 + $0x1ec] ss:$24 sps:$4 sm:$0xff]  }
  0xb8   :  { %2845 = vmatprep.subr.bf16.mxu0 %v3254_v6  ;;  %2908 = vmatpush3.bf16.msra.mxu1 %v3275_v17  ;;  %v3327_v6 = vld [vmem:[#allocation8 + $0x290] sm:$0xff]   ;;  %v3351_v16 = vld [vmem:[#allocation8 + $0x2a8] sm:$0xff]  }
  0xb9   :  { %2909 = vmatprep.subr.bf16.mxu1 %v3278_v20  ;;  %v3358_v17 = vld [vmem:[#allocation8 + $0x2f0] sm:$0xff]   ;;  %v3336_v20 = vld [vmem:[#allocation7 + $0x244] ss:$24 sps:$4 sm:$0xff]  }
  0xbb   :  { %2846 = vmatpush3.bf16.msra.mxu0 %v3255_v10  ;;  %v3342_v10 = vld [vmem:[#allocation8 + $0x2e0] sm:$0xff]  }
  0xbc   :  { %2847 = vmatprep.subr.bf16.mxu0 %v3264_v13  ;;  %2910 = vmatpush3.bf16.msra.mxu1 %v3279_v21  ;;  %v3330_v13 = vld [vmem:[#allocation7 + $0x21c] ss:$24 sps:$4 sm:$0xff]   ;;  %v3338_v21 = vld [vmem:[#allocation7 + $0x24c] ss:$24 sps:$4 sm:$0xff]  }
  0xbd   :  { %1180 = vmatmul.mubr.bf16.gmra.mrb[12].mxu0 %v3244_v9  ;;  %2911 = vmatprep.subr.bf16.mxu1 %v3286_v26  ;;  %v3324_v9 = vld [vmem:[#allocation7 + $0x1e0] ss:$24 sps:$4 sm:$0xff]  }
  0xbe   :  { %1277 = vmatmul.mubr.bf16.gmra.mrb[40].mxu1 %v3245_v11  ;;  %1187 = vmatprep.mubr.bf16.mxu0 %v3248_v12  ;;  %v3325_v11 = vld [vmem:[#allocation7 + $0x1e8] ss:$24 sps:$4 sm:$0xff]   ;;  %v3328_v12 = vld [vmem:[#allocation7 + $0x214] ss:$24 sps:$4 sm:$0xff]  }
  0xbf   :  { %1284 = vmatprep.mubr.bf16.mxu1 %v3250_v14  ;;  %2848 = vmatpush3.bf16.msra.mxu0 %v3265_v15  ;;  %v3343_v14 = vld [vmem:[#allocation8 + $0x2a0] sm:$0xff]   ;;  %v3350_v15 = vld [vmem:[#allocation8 + $0x2e8] sm:$0xff]  }
  0xc0   :  { %2849 = vmatprep.subr.bf16.mxu0 %v3276_v18  ;;  %2912 = vmatpush3.bf16.msra.mxu1 %v3287_v27  ;;  %v3332_v18 = vld [vmem:[#allocation7 + $0x210] ss:$24 sps:$4 sm:$0xff]   ;;  %v3344_v27 = vld [vmem:[#allocation7 + $0x274] ss:$24 sps:$4 sm:$0xff]  }
  0xc1   :  { %2913 = vmatprep.subr.bf16.mxu1 %v3290_v30  ;;  %v3341_v26 = vld [vmem:[#allocation7 + $0x248] ss:$24 sps:$4 sm:$0xff]   ;;  %v3349_v30 = vld [vmem:[#allocation7 + $0x278] ss:$24 sps:$4 sm:$0xff]  }
  0xc3   :  { %2850 = vmatpush3.bf16.msra.mxu0 %v3277_v19  ;;  %v3333_v19 = vld [vmem:[#allocation7 + $0x218] ss:$24 sps:$4 sm:$0xff]  }
  0xc4   :  { %2851 = vmatprep.subr.bf16.mxu0 %v3288_v28  ;;  %2914 = vmatpush3.bf16.msra.mxu1 %v3291_v31  ;;  %v3346_v28 = vld [vmem:[#allocation7 + $0x27c] ss:$24 sps:$4 sm:$0xff]  }
  0xc5   :  { %1188 = vmatmul.mubr.bf16.gmra.mrb[16].mxu0 %v3252_v22  ;;  %2915 = vmatprep.subr.bf16.mxu1 %v3298_v36  ;;  %v3359_v22 = vld [vmem:[#allocation8 + $0x2b0] sm:$0xff]   ;;  %v3352_v31 = vld [vmem:[#allocation7 + $0x2a4] ss:$24 sps:$4 sm:$0xff]  }
  0xc6   :  { %1285 = vmatmul.mubr.bf16.gmra.mrb[44].mxu1 %v3253_v23  ;;  %1195 = vmatprep.mubr.bf16.mxu0 %v3256_v24  ;;  %v3366_v23 = vld [vmem:[#allocation8 + $0x2f8] sm:$0xff]  }
  0xc7   :  { %1292 = vmatprep.mubr.bf16.mxu1 %v3258_v25  ;;  %2852 = vmatpush3.bf16.msra.mxu0 %v3289_v29  ;;  %v3367_v24 = vld [vmem:[#allocation8 + $0x2b8] sm:$0xff]   ;;  %v3348_v29 = vld [vmem:[#allocation7 + $0x270] ss:$24 sps:$4 sm:$0xff]  }
  0xc8   :  { %2916 = vmatpush3.bf16.msra.mxu1 %v3299_v37  ;;  %2853 = vmatprep.subr.bf16.mxu0 %v3300_v38  ;;  %v3340_v25 = vld [vmem:[#allocation7 + $0x240] ss:$24 sps:$4 sm:$0xff]   ;;  %v3362_v36 = vld [vmem:[#allocation7 + $0x2dc] ss:$24 sps:$4 sm:$0xff]   ;;  %v3364_v37 = vld [vmem:[#allocation7 + $0x2d0] ss:$24 sps:$4 sm:$0xff]  }
  0xc9   :  { %2917 = vmatprep.subr.bf16.mxu1 %v3302_v42  ;;  %v3365_v38 = vld [vmem:[#allocation7 + $0x2d8] ss:$24 sps:$4 sm:$0xff]   ;;  %v3371_v42 = vld [vmem:[#allocation7 + $0x1c4] ss:$24 sps:$4 sm:$0xff]  }
  0xcb   :  { %2854 = vmatpush3.bf16.msra.mxu0 %v3301_v39  ;;  %v3370_v39 = vld [vmem:[#allocation7 + $0x194] ss:$24 sps:$4 sm:$0xff]  }
  0xcc   :  { %2918 = vmatpush3.bf16.msra.mxu1 %v3303_v43  ;;  %2967 = vmatprep.subr.bf16.mxu0 %v3310_v48  ;;  %v3373_v43 = vld [vmem:[#allocation7 + $0x1c0] ss:$24 sps:$4 sm:$0xff]  }
  0xcd   :  { %1196 = vmatmul.mubr.bf16.gmra.mrb[20].mxu0 %v3260_v32  ;;  %v3354_v32 = vld [vmem:[#allocation7 + $0x2ac] ss:$24 sps:$4 sm:$0xff]   ;;  %v3379_v48 = vld [vmem:[#allocation7 + $0x220] ss:$24 sps:$4 sm:$0xff]  }
  0xce   :  { %1293 = vmatmul.mubr.bf16.gmra.mrb[48].mxu1 %v3261_v33  ;;  %1203 = vmatprep.mubr.bf16.mxu0 %v3268_v34  ;;  %v3356_v33 = vld [vmem:[#allocation7 + $0x2a0] ss:$24 sps:$4 sm:$0xff]  }
  0xcf   :  { %1300 = vmatprep.mubr.bf16.mxu1 %v3270_v35  ;;  %v3357_v34 = vld [vmem:[#allocation7 + $0x2a8] ss:$24 sps:$4 sm:$0xff]   ;;  %v3360_v35 = vld [vmem:[#allocation7 + $0x2d4] ss:$24 sps:$4 sm:$0xff]  }
  0xd5   :  { %1204 = vmatmul.mubr.bf16.gmra.mrb[24].mxu0 %v3272_v41  ;;  %v3368_v41 = vld [vmem:[#allocation7 + $0x190] ss:$24 sps:$4 sm:$0xff]  }
  0xd6   :  { %1301 = vmatmul.mubr.bf16.gmra.mrb[52].mxu1 %v3273_v44  ;;  %1211 = vmatprep.mubr.bf16.mxu0 %v3280_v46  ;;  %v3374_v44 = vld [vmem:[#allocation7 + $0x1f4] ss:$24 sps:$4 sm:$0xff]   ;;  %v3376_v46 = vld [vmem:[#allocation7 + $0x1f0] ss:$24 sps:$4 sm:$0xff]  }
  0xd7   :  { %1308 = vmatprep.mubr.bf16.mxu1 %v3282_v47  ;;  %v3377_v47 = vld [vmem:[#allocation7 + $0x224] ss:$24 sps:$4 sm:$0xff]  }
  0xdd   :  { %1212 = vmatmul.mubr.bf16.gmra.mrb[28].mxu0 %v3284_v49 }
  0xde   :  { %1309 = vmatmul.mubr.bf16.gmra.mrb[56].mxu1 %v3285_v50  ;;  %1219 = vmatprep.mubr.bf16.mxu0 %v3292_v51  ;;  %v3380_v50 = vld [vmem:[#allocation7 + $0x254] ss:$24 sps:$4 sm:$0xff]  }
  0xdf   :  { %1316 = vmatprep.mubr.bf16.mxu1 %v3294_v52 }
  0xe5   :  { %1220 = vmatmul.mubr.bf16.gmra.mrb[32].mxu0 %v3296_v53 }
  0xe6   :  { %1317 = vmatmul.mubr.bf16.gmra.mrb[60].mxu1 %v3297_v54  ;;  %2040 = vmatprep.mubr.bf16.mxu0 %v3306_v55 }
  0xe7   :  { %2137 = vmatprep.mubr.bf16.mxu1 %v3309_v56  ;;  %v3382_v56 = vld [vmem:[#allocation7 + $0x250] ss:$24 sps:$4 sm:$0xff]  }
  0xed   :  { %2041 = vmatmul.mubr.bf16.vlgmr.msra.gmra.mrb[36].mxu0 %v3304_v57 }
  0xee   :  { %2138 = vmatmul.mubr.bf16.vlgmr.msra.gmra.mrb[64].mxu1 %v3307_v58  ;;  %2968 = vmatpush3.bf16.msra.mxu0 %v3311_v59  ;;  %v3383_v58 = vld [vmem:[#allocation7 + $0x284] ss:$24 sps:$4 sm:$0xff]  }
  0xef   :  { %2048 = vmatprep.mubr.bf16.mxu0 %v3312_v60  ;;  %2145 = vmatprep.mubr.bf16.mxu1 %v3314_v61 }
  0xf0   :  { %2969 = vmatprep.subr.bf16.mxu0 %v3318_v62 }
  0xf2   :  { %2970 = vmatpush3.bf16.msra.mxu0 %v3319_v0 }
  0xf3   :  { %2971 = vmatprep.subr.bf16.mxu0 %v3326_v1  ;;  %v3385_v1 = vld [vmem:[#allocation7 + $0x280] ss:$24 sps:$4 sm:$0xff]  }
  0xf5   :  { %2049 = vmatmul.mubr.bf16.gmra.mrb[40].mxu0 %v3316_v2 }
  0xf6   :  { %2146 = vmatmul.mubr.bf16.gmra.mrb[68].mxu1 %v3317_v3  ;;  %2056 = vmatprep.mubr.bf16.mxu0 %v3320_v4  ;;  %v3386_v3 = vld [vmem:[#allocation7 + $0x2b4] ss:$24 sps:$4 sm:$0xff]  }
  0xf7   :  { %2153 = vmatprep.mubr.bf16.mxu1 %v3322_v5  ;;  %2972 = vmatpush3.bf16.msra.mxu0 %v3327_v6 }
  0xf8   :  { %2973 = vmatprep.subr.bf16.mxu0 %v3334_v7 }
  0xfb   :  { %2974 = vmatpush3.bf16.msra.mxu0 %v3335_v8 }
  0xfc   :  { %2975 = vmatprep.subr.bf16.mxu0 %v3342_v10 }
  0xfd   :  { %2057 = vmatmul.mubr.bf16.gmra.mrb[44].mxu0 %v3324_v9  ;;  %v3388_v9 = vld [vmem:[#allocation7 + $0x2b0] ss:$24 sps:$4 sm:$0xff]  }
  0xfe   :  { %2154 = vmatmul.mubr.bf16.gmra.mrb[72].mxu1 %v3325_v11  ;;  %2064 = vmatprep.mubr.bf16.mxu0 %v3328_v12  ;;  %v3389_v11 = vld [vmem:[#allocation7 + $0x2e4] ss:$24 sps:$4 sm:$0xff]  }
  0xff   :  { %2161 = vmatprep.mubr.bf16.mxu1 %v3330_v13  ;;  %2976 = vmatpush3.bf16.msra.mxu0 %v3343_v14 }
 0x100   :  { %2977 = vmatprep.subr.bf16.mxu0 %v3350_v15 }
 0x103   :  { %2978 = vmatpush3.bf16.msra.mxu0 %v3351_v16 }
 0x104   :  { %2979 = vmatprep.subr.bf16.mxu0 %v3358_v17 }
 0x105   :  { %2065 = vmatmul.mubr.bf16.gmra.mrb[48].mxu0 %v3332_v18 }
 0x106   :  { %2162 = vmatmul.mubr.bf16.gmra.mrb[76].mxu1 %v3333_v19  ;;  %2072 = vmatprep.mubr.bf16.mxu0 %v3336_v20  ;;  %v3391_v19 = vld [vmem:[#allocation7 + $0x2e0] ss:$24 sps:$4 sm:$0xff]  }
 0x107   :  { %2169 = vmatprep.mubr.bf16.mxu1 %v3338_v21  ;;  %2980 = vmatpush3.bf16.msra.mxu0 %v3359_v22 }
 0x108   :  { %2981 = vmatprep.subr.bf16.mxu0 %v3366_v23 }
 0x10b   :  { %2982 = vmatpush3.bf16.msra.mxu0 %v3367_v24 }
 0x10d   :  { %2073 = vmatmul.mubr.bf16.gmra.mrb[52].mxu0 %v3340_v25 }
 0x10e   :  { %2170 = vmatmul.mubr.bf16.gmra.mrb[80].mxu1 %v3341_v26  ;;  %2080 = vmatprep.mubr.bf16.mxu0 %v3344_v27 }
 0x10f   :  { %2177 = vmatprep.mubr.bf16.mxu1 %v3346_v28 }
 0x115   :  { %2081 = vmatmul.mubr.bf16.gmra.mrb[56].mxu0 %v3348_v29 }
 0x116   :  { %2178 = vmatmul.mubr.bf16.gmra.mrb[84].mxu1 %v3349_v30  ;;  %2088 = vmatprep.mubr.bf16.mxu0 %v3352_v31 }
 0x117   :  { %2185 = vmatprep.mubr.bf16.mxu1 %v3354_v32 }
 0x11d   :  { %2089 = vmatmul.mubr.bf16.gmra.mrb[60].mxu0 %v3356_v33 }
 0x11e   :  { %2186 = vmatmul.mubr.bf16.gmra.mrb[88].mxu1 %v3357_v34  ;;  %2096 = vmatprep.mubr.bf16.mxu0 %v3360_v35 }
 0x11f   :  { %2193 = vmatprep.mubr.bf16.mxu1 %v3362_v36 }
 0x125   :  { %2097 = vmatmul.mubr.bf16.gmra.mrb[64].mxu0 %v3364_v37 }
 0x126   :  { %2194 = vmatmul.mubr.bf16.gmra.mrb[92].mxu1 %v3365_v38  ;;  %2234 = vmatprep.mubr.bf16.mxu0 %v3370_v39 }
 0x12d   :  { %2235 = vmatmul.mubr.bf16.vlgmr.msra.gmra.mrb[68].mxu0 %v3368_v41 }
 0x12e   :  { %2242 = vmatprep.mubr.bf16.mxu0 %v3371_v42 }
 0x135   :  { %2243 = vmatmul.mubr.bf16.gmra.mrb[72].mxu0 %v3373_v43 }
 0x136   :  { %2250 = vmatprep.mubr.bf16.mxu0 %v3374_v44 }
 0x13d   :  { %2251 = vmatmul.mubr.bf16.gmra.mrb[76].mxu0 %v3376_v46 }
 0x13e   :  { %2258 = vmatprep.mubr.bf16.mxu0 %v3377_v47 }
 0x141   :  { %v2663_v49 = vpop.f32.mrb[0].mxu1 }
 0x142   :  { %v2664_v51 = vpop.f32.mrb[1].mxu1 }
 0x143   :  { %v3631_v52 = vadd.f32 %v2664_v51, %v2663_v49  ;;  %v2666_v53 = vpop.f32.mrb[2].mxu1 }
 0x144   :  { %v2667_v54 = vpop.f32.mrb[3].mxu1 }
 0x145   :  { %2259 = vmatmul.mubr.bf16.gmra.mrb[80].mxu0 %v3379_v48  ;;  %v3633_v55 = vadd.f32 %v2667_v54, %v2666_v53 }
 0x146   :  { %2266 = vmatprep.mubr.bf16.mxu0 %v3380_v50 }
 0x149   :  { %v2669_v57 = vpop.f32.mrb[4].mxu1 }
 0x14a   :  { %v2670_v59 = vpop.f32.mrb[5].mxu1 }
 0x14b   :  { %v3635_v60 = vadd.f32 %v2670_v59, %v2669_v57  ;;  %v2672_v61 = vpop.f32.mrb[6].mxu1 }
 0x14c   :  { %v2673_v62 = vpop.f32.mrb[7].mxu1 }
 0x14d   :  { %2267 = vmatmul.mubr.bf16.gmra.mrb[84].mxu0 %v3382_v56  ;;  %v3637_v0 = vadd.f32 %v2673_v62, %v2672_v61 }
 0x14e   :  { %2274 = vmatprep.mubr.bf16.mxu0 %v3383_v58 }
 0x151   :  { %v2675_v2 = vpop.f32.mrb[8].mxu1 }
 0x152   :  { %v2676_v4 = vpop.f32.mrb[9].mxu1 }
 0x153   :  { %v3639_v5 = vadd.f32 %v2676_v4, %v2675_v2  ;;  %v2678_v6 = vpop.f32.mrb[10].mxu1 }
 0x154   :  { %v2679_v7 = vpop.f32.mrb[11].mxu1 }
 0x155   :  { %2275 = vmatmul.mubr.bf16.gmra.mrb[88].mxu0 %v3385_v1  ;;  %v3641_v8 = vadd.f32 %v2679_v7, %v2678_v6 }
 0x156   :  { %2282 = vmatprep.mubr.bf16.mxu0 %v3386_v3 }
 0x159   :  { %v2681_v10 = vpop.f32.mrb[12].mxu1 }
 0x15a   :  { %v2682_v12 = vpop.f32.mrb[13].mxu1 }
 0x15b   :  { %v3643_v13 = vadd.f32 %v2682_v12, %v2681_v10  ;;  %v2684_v14 = vpop.f32.mrb[14].mxu1 }
 0x15c   :  { %v2685_v15 = vpop.f32.mrb[15].mxu1 }
 0x15d   :  { %2283 = vmatmul.mubr.bf16.gmra.mrb[92].mxu0 %v3388_v9  ;;  %v3645_v16 = vadd.f32 %v2685_v15, %v2684_v14 }
 0x15e   :  { %2290 = vmatprep.mubr.bf16.mxu0 %v3389_v11 }
 0x160   :  { %v3647_v17 = vpop.f32.mrb[0].mxu0 }
 0x161   :  { %v3649_v18 = vpop.f32.mrb[1].mxu0  ;;  %v2687_v20 = vpop.f32.mrb[16].mxu1 }
 0x162   :  { %v3651_v21 = vpop.f32.mrb[2].mxu0  ;;  %v2688_v22 = vpop.f32.mrb[17].mxu1 }
 0x163   :  { %v3655_v24 = vpop.f32.mrb[3].mxu0  ;;  %v3657_v25 = vadd.f32 %v2688_v22, %v2687_v20  ;;  %v2690_v26 = vpop.f32.mrb[18].mxu1  ;;  %v3526_v20 = vmov 0.0  }
 0x164   :  { %v2299_v27 = vpack.c.bf16 %v3655_v24, %v3649_v18  ;;  %v2691_v28 = vpop.f32.mrb[19].mxu1  ;;  %3049 = vmatprep.subr.bf16.mxu1 %v3526_v20  ;;  %3065 = vmatprep.mubr.msk.bf16.mxu1 %vm3527_vm0, %v3526_v20  ;;  %v3871_v24 = vpack.c.bf16 %v3651_v21, %v3647_v17 }
 0x165   :  { %2291 = vmatmul.mubr.bf16.gmra.mrb[96].mxu0 %v3391_v19  ;;  %v3661_v29 = vadd.f32 %v2691_v28, %v2690_v26 }
 0x169   :  { %v2693_v30 = vpop.f32.mrb[20].mxu1 }
 0x16a   :  { %v2694_v31 = vpop.f32.mrb[21].mxu1 }
 0x16b   :  { %v3663_v32 = vadd.f32 %v2694_v31, %v2693_v30  ;;  %v2696_v33 = vpop.f32.mrb[22].mxu1 }
 0x16c   :  { %v2697_v34 = vpop.f32.mrb[23].mxu1 }
 0x16d   :  { %v3665_v35 = vadd.f32 %v2697_v34, %v2696_v33 }
 0x171   :  { %v2699_v36 = vpop.f32.mrb[24].mxu1 }
 0x172   :  { %v2700_v37 = vpop.f32.mrb[25].mxu1 }
 0x173   :  { %v3667_v38 = vadd.f32 %v2700_v37, %v2699_v36  ;;  %v2702_v39 = vpop.f32.mrb[26].mxu1 }
 0x174   :  { %v2703_v41 = vpop.f32.mrb[27].mxu1 }
 0x175   :  { %v3669_v42 = vadd.f32 %v2703_v41, %v2702_v39 }
 0x179   :  { %v2705_v43 = vpop.f32.mrb[28].mxu1 }
 0x17a   :  { %v2706_v44 = vpop.f32.mrb[29].mxu1 }
 0x17b   :  { %v3671_v46 = vadd.f32 %v2706_v44, %v2705_v43  ;;  %v2708_v47 = vpop.f32.mrb[30].mxu1 }
 0x17c   :  { %v2709_v48 = vpop.f32.mrb[31].mxu1 }
 0x17d   :  { %v3673_v49 = vadd.f32 %v2709_v48, %v2708_v47 }
 0x180   :  { %v2727_v50 = vpop.f32.mrb[4].mxu0 }
 0x181   :  { %v2728_v51 = vpop.f32.mrb[5].mxu0  ;;  %v2791_v53 = vpop.f32.mrb[32].mxu1 }
 0x182   :  { %v2729_v54 = vadd.f32 %v2728_v51, %v2727_v50  ;;  %v2730_v56 = vpop.f32.mrb[6].mxu0  ;;  %v2792_v57 = vpop.f32.mrb[33].mxu1 }
 0x183   :  { %v2731_v58 = vpop.f32.mrb[7].mxu0  ;;  %v2793_v59 = vadd.f32 %v2792_v57, %v2791_v53  ;;  %v2794_v61 = vpop.f32.mrb[34].mxu1 }
 0x184   :  { %v1166_v62 = vadd.f32 %v2729_v54, %v3631_v52  ;;  %v2732_v1 = vadd.f32 %v2731_v58, %v2730_v56  ;;  %v2795_v2 = vpop.f32.mrb[35].mxu1 }
 0x185   :  { %v2796_v3 = vadd.f32 %v2795_v2, %v2794_v61 }
 0x186   :  { %v1169_v4 = vadd.f32 %v2732_v1, %v3633_v55  ;;  %v3677_v6 = vadd.f32 %v2793_v59, %v1166_v62 }
 0x188   :  { %v3679_v7 = vadd.f32 %v2796_v3, %v1169_v4  ;;  %v2733_v9 = vpop.f32.mrb[8].mxu0 }
 0x189   :  { %v2734_v10 = vpop.f32.mrb[9].mxu0  ;;  %v2797_v11 = vpop.f32.mrb[36].mxu1 }
 0x18a   :  { %v1326_v12 = vpack.c.bf16 %v3679_v7, %v3677_v6  ;;  %v2735_v14 = vadd.f32 %v2734_v10, %v2733_v9  ;;  %v2736_v15 = vpop.f32.mrb[10].mxu0  ;;  %v2798_v19 = vpop.f32.mrb[37].mxu1 }
 0x18b   :  { %v2737_v52 = vpop.f32.mrb[11].mxu0  ;;  %v2799_v22 = vadd.f32 %v2798_v19, %v2797_v11  ;;  %v2800_v26 = vpop.f32.mrb[38].mxu1 }
 0x18c   :  { %v1174_v55 = vadd.f32 %v2735_v14, %v3635_v60  ;;  %v2738_v28 = vadd.f32 %v2737_v52, %v2736_v15  ;;  %v2801_v30 = vpop.f32.mrb[39].mxu1 }
 0x18d   :  { %v2802_v31 = vadd.f32 %v2801_v30, %v2800_v26 }
 0x18e   :  { %v1177_v33 = vadd.f32 %v2738_v28, %v3637_v0  ;;  %v3686_v34 = vadd.f32 %v2799_v22, %v1174_v55 }
 0x190   :  { %v3688_v36 = vadd.f32 %v2802_v31, %v1177_v33  ;;  %v2739_v37 = vpop.f32.mrb[12].mxu0 }
 0x191   :  { %v2740_v39 = vpop.f32.mrb[13].mxu0  ;;  %v2803_v41 = vpop.f32.mrb[40].mxu1 }
 0x192   :  { %v1327_v43 = vpack.c.bf16 %v3688_v36, %v3686_v34  ;;  %v2741_v44 = vadd.f32 %v2740_v39, %v2739_v37  ;;  %v2742_v47 = vpop.f32.mrb[14].mxu0  ;;  %v2804_v48 = vpop.f32.mrb[41].mxu1 }
 0x193   :  { %v2743_v50 = vpop.f32.mrb[15].mxu0  ;;  %v2805_v60 = vadd.f32 %v2804_v48, %v2803_v41  ;;  %v2806_v51 = vpop.f32.mrb[42].mxu1 }
 0x194   :  { %v1182_v53 = vadd.f32 %v2741_v44, %v3639_v5  ;;  %v2744_v54 = vadd.f32 %v2743_v50, %v2742_v47  ;;  %v2807_v0 = vpop.f32.mrb[43].mxu1 }
 0x195   :  { %v2808_v56 = vadd.f32 %v2807_v0, %v2806_v51 }
 0x196   :  { %v1185_v57 = vadd.f32 %v2744_v54, %v3641_v8  ;;  %v3694_v58 = vadd.f32 %v2805_v60, %v1182_v53 }
 0x198   :  { %v3696_v59 = vadd.f32 %v2808_v56, %v1185_v57  ;;  %v2745_v61 = vpop.f32.mrb[16].mxu0 }
 0x199   :  { %v2746_v62 = vpop.f32.mrb[17].mxu0  ;;  %v2809_v1 = vpop.f32.mrb[44].mxu1 }
 0x19a   :  { %v1328_v2 = vpack.c.bf16 %v3696_v59, %v3694_v58  ;;  %v2747_v3 = vadd.f32 %v2746_v62, %v2745_v61  ;;  %v2748_v4 = vpop.f32.mrb[18].mxu0  ;;  %v2810_v9 = vpop.f32.mrb[45].mxu1 }
 0x19b   :  { %v2749_v10 = vpop.f32.mrb[19].mxu0  ;;  %v2811_v5 = vadd.f32 %v2810_v9, %v2809_v1  ;;  %v2812_v11 = vpop.f32.mrb[46].mxu1 }
 0x19c   :  { %v1190_v14 = vadd.f32 %v2747_v3, %v3643_v13  ;;  %v2750_v15 = vadd.f32 %v2749_v10, %v2748_v4  ;;  %v2813_v8 = vpop.f32.mrb[47].mxu1 }
 0x19d   :  { %v2814_v19 = vadd.f32 %v2813_v8, %v2812_v11 }
 0x19e   :  { %v1193_v52 = vadd.f32 %v2750_v15, %v3645_v16  ;;  %v3702_v22 = vadd.f32 %v2811_v5, %v1190_v14 }
 0x1a0   :  { %v3704_v26 = vadd.f32 %v2814_v19, %v1193_v52  ;;  %v2751_v55 = vpop.f32.mrb[20].mxu0 }
 0x1a1   :  { %v2752_v28 = vpop.f32.mrb[21].mxu0  ;;  %v2815_v30 = vpop.f32.mrb[48].mxu1 }
 0x1a2   :  { %v1329_v31 = vpack.c.bf16 %v3704_v26, %v3702_v22  ;;  %v2753_v33 = vadd.f32 %v2752_v28, %v2751_v55  ;;  %v2754_v37 = vpop.f32.mrb[22].mxu0  ;;  %v2816_v39 = vpop.f32.mrb[49].mxu1 }
 0x1a3   :  { %v2755_v41 = vpop.f32.mrb[23].mxu0  ;;  %v2817_v13 = vadd.f32 %v2816_v39, %v2815_v30  ;;  %v2818_v44 = vpop.f32.mrb[50].mxu1 }
 0x1a4   :  { %v1198_v47 = vadd.f32 %v2753_v33, %v3657_v25  ;;  %v2756_v48 = vadd.f32 %v2755_v41, %v2754_v37  ;;  %v2819_v16 = vpop.f32.mrb[51].mxu1 }
 0x1a5   :  { %v2820_v50 = vadd.f32 %v2819_v16, %v2818_v44 }
 0x1a6   :  { %v1201_v60 = vadd.f32 %v2756_v48, %v3661_v29  ;;  %v3710_v51 = vadd.f32 %v2817_v13, %v1198_v47 }
 0x1a8   :  { %v3712_v53 = vadd.f32 %v2820_v50, %v1201_v60  ;;  %v2757_v54 = vpop.f32.mrb[24].mxu0 }
 0x1a9   :  { %v2758_v0 = vpop.f32.mrb[25].mxu0  ;;  %v2821_v56 = vpop.f32.mrb[52].mxu1 }
 0x1aa   :  { %v1330_v57 = vpack.c.bf16 %v3712_v53, %v3710_v51  ;;  %v2759_v61 = vadd.f32 %v2758_v0, %v2757_v54  ;;  %v2760_v62 = vpop.f32.mrb[26].mxu0  ;;  %v2822_v1 = vpop.f32.mrb[53].mxu1 }
 0x1ab   :  { %v2761_v3 = vpop.f32.mrb[27].mxu0  ;;  %v2823_v25 = vadd.f32 %v2822_v1, %v2821_v56  ;;  %v2824_v4 = vpop.f32.mrb[54].mxu1 }
 0x1ac   :  { %v1206_v9 = vadd.f32 %v2759_v61, %v3663_v32  ;;  %v2762_v10 = vadd.f32 %v2761_v3, %v2760_v62  ;;  %v2825_v29 = vpop.f32.mrb[55].mxu1 }
 0x1ad   :  { %v2826_v5 = vadd.f32 %v2825_v29, %v2824_v4 }
 0x1ae   :  { %v1209_v11 = vadd.f32 %v2762_v10, %v3665_v35  ;;  %v3718_v14 = vadd.f32 %v2823_v25, %v1206_v9 }
 0x1b0   :  { %v3720_v15 = vadd.f32 %v2826_v5, %v1209_v11  ;;  %v2763_v8 = vpop.f32.mrb[28].mxu0 }
 0x1b1   :  { %v2764_v19 = vpop.f32.mrb[29].mxu0  ;;  %v2827_v52 = vpop.f32.mrb[56].mxu1 }
 0x1b2   :  { %v1331_v55 = vpack.c.bf16 %v3720_v15, %v3718_v14  ;;  %v2765_v28 = vadd.f32 %v2764_v19, %v2763_v8  ;;  %v2766_v30 = vpop.f32.mrb[30].mxu0  ;;  %v2828_v33 = vpop.f32.mrb[57].mxu1 }
 0x1b3   :  { %v2767_v37 = vpop.f32.mrb[31].mxu0  ;;  %v2829_v32 = vadd.f32 %v2828_v33, %v2827_v52  ;;  %v2830_v39 = vpop.f32.mrb[58].mxu1 }
 0x1b4   :  { %v1214_v41 = vadd.f32 %v2765_v28, %v3667_v38  ;;  %v2768_v13 = vadd.f32 %v2767_v37, %v2766_v30  ;;  %v2831_v35 = vpop.f32.mrb[59].mxu1 }
 0x1b5   :  { %v2832_v44 = vadd.f32 %v2831_v35, %v2830_v39 }
 0x1b6   :  { %v1217_v47 = vadd.f32 %v2768_v13, %v3669_v42  ;;  %v3726_v48 = vadd.f32 %v2829_v32, %v1214_v41 }
 0x1b8   :  { %v3728_v16 = vadd.f32 %v2832_v44, %v1217_v47  ;;  %v2769_v50 = vpop.f32.mrb[32].mxu0 }
 0x1b9   :  { %v2770_v60 = vpop.f32.mrb[33].mxu0  ;;  %v2833_v54 = vpop.f32.mrb[60].mxu1 }
 0x1ba   :  { %v1332_v0 = vpack.c.bf16 %v3728_v16, %v3726_v48  ;;  %v2771_v56 = vadd.f32 %v2770_v60, %v2769_v50  ;;  %v2772_v61 = vpop.f32.mrb[34].mxu0  ;;  %v2834_v62 = vpop.f32.mrb[61].mxu1 }
 0x1bb   :  { %v2773_v1 = vpop.f32.mrb[35].mxu0  ;;  %v2835_v38 = vadd.f32 %v2834_v62, %v2833_v54  ;;  %v2836_v3 = vpop.f32.mrb[62].mxu1 }
 0x1bc   :  { %v1222_v25 = vadd.f32 %v2771_v56, %v3671_v46  ;;  %v2774_v4 = vadd.f32 %v2773_v1, %v2772_v61  ;;  %v2837_v42 = vpop.f32.mrb[63].mxu1 }
 0x1bd   :  { %v2838_v9 = vadd.f32 %v2837_v42, %v2836_v3 }
 0x1be   :  { %v1225_v10 = vadd.f32 %v2774_v4, %v3673_v49  ;;  %v3734_v29 = vadd.f32 %v2835_v38, %v1222_v25 }
 0x1c0   :  { %v3736_v5 = vadd.f32 %v2838_v9, %v1225_v10  ;;  %v2855_v11 = vpop.f32.mrb[36].mxu0 }
 0x1c1   :  { %v2919_v8 = vpop.f32.mrb[64].mxu1  ;;  %v2856_v19 = vpop.f32.mrb[37].mxu0 }
 0x1c2   :  { %v2857_v28 = vadd.f32 %v2856_v19, %v2855_v11  ;;  %v2920_v30 = vpop.f32.mrb[65].mxu1  ;;  %v2858_v33 = vpop.f32.mrb[38].mxu0  ;;  %v3870_v18 = vpack.c.bf16 %v3736_v5, %v3734_v29 }
 0x1c3   :  { %v2921_v37 = vadd.f32 %v2920_v30, %v2919_v8  ;;  %v2922_v46 = vpop.f32.mrb[66].mxu1  ;;  %v2859_v32 = vpop.f32.mrb[39].mxu0 }
 0x1c4   :  { %v2860_v49 = vadd.f32 %v2859_v32, %v2858_v33  ;;  %v2923_v39 = vpop.f32.mrb[67].mxu1 }
 0x1c5   :  { %v3742_v41 = vadd.f32 %v2921_v37, %v2857_v28  ;;  %v2924_v13 = vadd.f32 %v2923_v39, %v2922_v46 }
 0x1c7   :  { %v3744_v35 = vadd.f32 %v2924_v13, %v2860_v49 }
 0x1c8   :  { %v2861_v44 = vpop.f32.mrb[40].mxu0 }
 0x1c9   :  { %v2925_v47 = vpop.f32.mrb[68].mxu1  ;;  %v2862_v50 = vpop.f32.mrb[41].mxu0 }
 0x1ca   :  { %v2863_v60 = vadd.f32 %v2862_v50, %v2861_v44  ;;  %v2926_v54 = vpop.f32.mrb[69].mxu1  ;;  %v2864_v56 = vpop.f32.mrb[42].mxu0 }
 0x1cb   :  { %v2927_v61 = vadd.f32 %v2926_v54, %v2925_v47  ;;  %v2928_v62 = vpop.f32.mrb[70].mxu1  ;;  %v2865_v1 = vpop.f32.mrb[43].mxu0 }
 0x1cc   :  { %v2866_v38 = vadd.f32 %v2865_v1, %v2864_v56  ;;  %v2929_v3 = vpop.f32.mrb[71].mxu1 }
 0x1cd   :  { %v3746_v25 = vadd.f32 %v2927_v61, %v2863_v60  ;;  %v2930_v4 = vadd.f32 %v2929_v3, %v2928_v62 }
 0x1cf   :  { %v3748_v42 = vadd.f32 %v2930_v4, %v2866_v38 }
 0x1d0   :  { %v2867_v9 = vpop.f32.mrb[44].mxu0 }
 0x1d1   :  { %v2931_v10 = vpop.f32.mrb[72].mxu1  ;;  %v2868_v11 = vpop.f32.mrb[45].mxu0 }
 0x1d2   :  { %v2869_v8 = vadd.f32 %v2868_v11, %v2867_v9  ;;  %v2932_v19 = vpop.f32.mrb[73].mxu1  ;;  %v2870_v28 = vpop.f32.mrb[46].mxu0 }
 0x1d3   :  { %v2933_v30 = vadd.f32 %v2932_v19, %v2931_v10  ;;  %v2934_v33 = vpop.f32.mrb[74].mxu1  ;;  %v2871_v37 = vpop.f32.mrb[47].mxu0 }
 0x1d4   :  { %v2872_v46 = vadd.f32 %v2871_v37, %v2870_v28  ;;  %v2935_v32 = vpop.f32.mrb[75].mxu1 }
 0x1d5   :  { %v3750_v49 = vadd.f32 %v2933_v30, %v2869_v8  ;;  %v2936_v39 = vadd.f32 %v2935_v32, %v2934_v33 }
 0x1d7   :  { %v3752_v13 = vadd.f32 %v2936_v39, %v2872_v46 }
 0x1d8   :  { %v2873_v44 = vpop.f32.mrb[48].mxu0 }
 0x1d9   :  { %v2937_v47 = vpop.f32.mrb[76].mxu1  ;;  %v2874_v50 = vpop.f32.mrb[49].mxu0 }
 0x1da   :  { %v2875_v60 = vadd.f32 %v2874_v50, %v2873_v44  ;;  %v2938_v54 = vpop.f32.mrb[77].mxu1  ;;  %v2876_v56 = vpop.f32.mrb[50].mxu0 }
 0x1db   :  { %v2939_v61 = vadd.f32 %v2938_v54, %v2937_v47  ;;  %v2940_v62 = vpop.f32.mrb[78].mxu1  ;;  %v2877_v1 = vpop.f32.mrb[51].mxu0 }
 0x1dc   :  { %v2878_v38 = vadd.f32 %v2877_v1, %v2876_v56  ;;  %v2941_v3 = vpop.f32.mrb[79].mxu1  ;;  %v3392_v1 = vld [vmem:[#allocation2] sm:$0xff] }
 0x1dd   :  { %v3754_v4 = vadd.f32 %v2939_v61, %v2875_v60  ;;  %v2942_v9 = vadd.f32 %v2941_v3, %v2940_v62  ;;  %v105_v60 = vld [vmem:[%s3864_s2] sm:$0x3]  ;;  %v3393_v3 = vld [vmem:[#allocation2 + $0x8] sm:$0xff] }
 0x1de   :  { %v110_v54 = vrot.slane %v105_v60, %v91_v63  ;;  %v114_v56 = vrot.slane %v105_v60, %v95_v45 }
 0x1df   :  { %v3756_v10 = vadd.f32 %v2942_v9, %v2878_v38 }
 0x1e0   :  { %v2879_v11 = vpop.f32.mrb[52].mxu0  ;;  %v117_v38 = vmul.f32 %v3392_v1, %v110_v54  ;;  %v118_v9 = vmul.f32 %v3393_v3, %v114_v56 }
 0x1e1   :  { %v2943_v8 = vpop.f32.mrb[80].mxu1  ;;  %v2880_v19 = vpop.f32.mrb[53].mxu0 }
 0x1e2   :  { %v2881_v28 = vadd.f32 %v2880_v19, %v2879_v11  ;;  %v2944_v30 = vpop.f32.mrb[81].mxu1  ;;  %v2882_v33 = vpop.f32.mrb[54].mxu0  ;;  %v3394_v11 = vld [vmem:[#allocation2 + $0x10] sm:$0xff]  ;;  %v3395_v19 = vld [vmem:[#allocation2 + $0x18] sm:$0xff]  ;;  %v121_v63 = vadd.f32 %v118_v9, %v117_v38 }
 0x1e3   :  { %v2945_v37 = vadd.f32 %v2944_v30, %v2943_v8  ;;  %v2946_v46 = vpop.f32.mrb[82].mxu1  ;;  %v2883_v32 = vpop.f32.mrb[55].mxu0  ;;  %v119_v8 = vmul.f32 %v3394_v11, %v110_v54 }
 0x1e4   :  { %v2884_v39 = vadd.f32 %v2883_v32, %v2882_v33  ;;  %v2947_v44 = vpop.f32.mrb[83].mxu1  ;;  %122 = vadd.xlane.f32.xlu0 %v121_v63 }
 0x1e5   :  { %v3758_v47 = vadd.f32 %v2945_v37, %v2881_v28  ;;  %v2948_v50 = vadd.f32 %v2947_v44, %v2946_v46  ;;  %v120_v28 = vmul.f32 %v3395_v19, %v114_v56 }
 0x1e7   :  { %v3767_v61 = vadd.f32 %v2948_v50, %v2884_v39  ;;  %v124_v60 = vadd.f32 %v120_v28, %v119_v8 }
 0x1e8   :  { %v2885_v62 = vpop.f32.mrb[56].mxu0 }
 0x1e9   :  { %v2949_v30 = vpop.f32.mrb[84].mxu1  ;;  %v2886_v33 = vpop.f32.mrb[57].mxu0  ;;  %125 = vadd.xlane.f32.xlu0 %v124_v60 }
 0x1ea   :  { %v2887_v37 = vadd.f32 %v2886_v33, %v2885_v62  ;;  %v2950_v46 = vpop.f32.mrb[85].mxu1  ;;  %v2888_v32 = vpop.f32.mrb[58].mxu0 }
 0x1eb   :  { %v2951_v44 = vadd.f32 %v2950_v46, %v2949_v30  ;;  %v2952_v40 = vpop.f32.mrb[86].mxu1  ;;  %v2889_v45 = vpop.f32.mrb[59].mxu0 }
 0x1ec   :  { %v2890_v39 = vadd.f32 %v2889_v45, %v2888_v32  ;;  %v2953_v50 = vpop.f32.mrb[87].mxu1 }
 0x1ed   :  { %v3769_v1 = vadd.f32 %v2951_v44, %v2887_v37  ;;  %v2954_v3 = vadd.f32 %v2953_v50, %v2952_v40 }
 0x1ef   :  { %v3771_v23 = vadd.f32 %v2954_v3, %v2890_v39 }
 0x1f0   :  { %v2891_v54 = vpop.f32.mrb[60].mxu0 }
 0x1f1   :  { %v2955_v56 = vpop.f32.mrb[88].mxu1  ;;  %v2892_v11 = vpop.f32.mrb[61].mxu0 }
 0x1f2   :  { %v2893_v62 = vadd.f32 %v2892_v11, %v2891_v54  ;;  %v2956_v19 = vpop.f32.mrb[89].mxu1  ;;  %v2894_v33 = vpop.f32.mrb[62].mxu0 }
 0x1f3   :  { %v2957_v38 = vadd.f32 %v2956_v19, %v2955_v56  ;;  %v2958_v9 = vpop.f32.mrb[90].mxu1  ;;  %v2895_v30 = vpop.f32.mrb[63].mxu0 }
 0x1f4   :  { %v2896_v46 = vadd.f32 %v2895_v30, %v2894_v33  ;;  %v2959_v32 = vpop.f32.mrb[91].mxu1 }
 0x1f5   :  { %v3773_v45 = vadd.f32 %v2957_v38, %v2893_v62  ;;  %v2960_v8 = vadd.f32 %v2959_v32, %v2958_v9 }
 0x1f7   :  { %v3775_v28 = vadd.f32 %v2960_v8, %v2896_v46 }
 0x1f8   :  { %v2897_v37 = vpop.f32.mrb[64].mxu0 }
 0x1f9   :  { %v2961_v63 = vpop.f32.mrb[92].mxu1  ;;  %v2898_v44 = vpop.f32.mrb[65].mxu0 }
 0x1fa   :  { %v2899_v40 = vadd.f32 %v2898_v44, %v2897_v37  ;;  %v2962_v39 = vpop.f32.mrb[93].mxu1  ;;  %v2900_v50 = vpop.f32.mrb[66].mxu0 }
 0x1fb   :  { %v2963_v60 = vadd.f32 %v2962_v39, %v2961_v63  ;;  %v2964_v3 = vpop.f32.mrb[94].mxu1  ;;  %v2901_v54 = vpop.f32.mrb[67].mxu0 }
 0x1fc   :  { %v2902_v11 = vadd.f32 %v2901_v54, %v2900_v50  ;;  %v2965_v56 = vpop.f32.mrb[95].mxu1 }
 0x1fd   :  { %v3777_v19 = vadd.f32 %v2963_v60, %v2899_v40  ;;  %v2966_v33 = vadd.f32 %v2965_v56, %v2964_v3 }
 0x1ff   :  { %v3779_v30 = vadd.f32 %v2966_v33, %v2902_v11 }
 0x200   :  { %v2983_v62 = vpop.f32.mrb[68].mxu0 }
 0x201   :  { %v2984_v38 = vpop.f32.mrb[69].mxu0 }
 0x202   :  { %v2985_v9 = vadd.f32 %v2984_v38, %v2983_v62  ;;  %v2986_v46 = vpop.f32.mrb[70].mxu0 }
 0x203   :  { %v2987_v32 = vpop.f32.mrb[71].mxu0 }
 0x204   :  { %v2237_v8 = vadd.f32 %v2985_v9, %v3742_v41  ;;  %v2988_v37 = vadd.f32 %v2987_v32, %v2986_v46 }
 0x206   :  { %v2240_v44 = vadd.f32 %v2988_v37, %v3744_v35 }
 0x208   :  { %v2300_v63 = vpack.c.bf16 %v2240_v44, %v2237_v8  ;;  %v2989_v39 = vpop.f32.mrb[72].mxu0 }
 0x209   :  { %v2990_v52 = vpop.f32.mrb[73].mxu0 }
 0x20a   :  { %v2991_v50 = vadd.f32 %v2990_v52, %v2989_v39  ;;  %v2992_v54 = vpop.f32.mrb[74].mxu0  ;;  %3050 = vmatpush3.bf16.msra.mxu1 %v2300_v63 }
 0x20b   :  { %v2993_v40 = vpop.f32.mrb[75].mxu0  ;;  %3051 = vmatprep.subr.bf16.mxu1 %v3526_v20 }
 0x20c   :  { %v2245_v60 = vadd.f32 %v2991_v50, %v3746_v25  ;;  %v2994_v3 = vadd.f32 %v2993_v40, %v2992_v54 }
 0x20e   :  { %v2248_v11 = vadd.f32 %v2994_v3, %v3748_v42 }
 0x210   :  { %v2301_v56 = vpack.c.bf16 %v2248_v11, %v2245_v60  ;;  %v2995_v33 = vpop.f32.mrb[76].mxu0 }
 0x211   :  { %v2996_v41 = vpop.f32.mrb[77].mxu0 }
 0x212   :  { %v2997_v62 = vadd.f32 %v2996_v41, %v2995_v33  ;;  %v2998_v38 = vpop.f32.mrb[78].mxu0  ;;  %3052 = vmatpush3.bf16.msra.mxu1 %v2301_v56 }
 0x213   :  { %v2999_v35 = vpop.f32.mrb[79].mxu0  ;;  %3053 = vmatprep.subr.bf16.mxu1 %v3526_v20 }
 0x214   :  { %v2253_v52 = vadd.f32 %v2997_v62, %v3750_v49  ;;  %v3000_v9 = vadd.f32 %v2999_v35, %v2998_v38 }
 0x216   :  { %v2256_v46 = vadd.f32 %v3000_v9, %v3752_v13 }
 0x218   :  { %v2302_v32 = vpack.c.bf16 %v2256_v46, %v2253_v52  ;;  %v3001_v8 = vpop.f32.mrb[80].mxu0 }
 0x219   :  { %v3002_v25 = vpop.f32.mrb[81].mxu0 }
 0x21a   :  { %v3003_v37 = vadd.f32 %v3002_v25, %v3001_v8  ;;  %v3004_v44 = vpop.f32.mrb[82].mxu0  ;;  %3054 = vmatpush3.bf16.msra.mxu1 %v2302_v32 }
 0x21b   :  { %v3005_v42 = vpop.f32.mrb[83].mxu0  ;;  %3055 = vmatprep.subr.bf16.mxu1 %v3526_v20 }
 0x21c   :  { %v2261_v63 = vadd.f32 %v3003_v37, %v3754_v4  ;;  %v3006_v39 = vadd.f32 %v3005_v42, %v3004_v44 }
 0x21e   :  { %v2264_v50 = vadd.f32 %v3006_v39, %v3756_v10 }
 0x220   :  { %v2303_v54 = vpack.c.bf16 %v2264_v50, %v2261_v63  ;;  %v3007_v40 = vpop.f32.mrb[84].mxu0 }
 0x221   :  { %v3008_v49 = vpop.f32.mrb[85].mxu0 }
 0x222   :  { %v3009_v60 = vadd.f32 %v3008_v49, %v3007_v40  ;;  %v3010_v3 = vpop.f32.mrb[86].mxu0  ;;  %3056 = vmatpush3.bf16.msra.mxu1 %v2303_v54 }
 0x223   :  { %v3011_v13 = vpop.f32.mrb[87].mxu0  ;;  %3057 = vmatprep.subr.bf16.mxu1 %v3526_v20 }
 0x224   :  { %v2269_v11 = vadd.f32 %v3009_v60, %v3758_v47  ;;  %v3012_v56 = vadd.f32 %v3011_v13, %v3010_v3 }
 0x226   :  { %v2272_v33 = vadd.f32 %v3012_v56, %v3767_v61 }
 0x228   :  { %v2304_v41 = vpack.c.bf16 %v2272_v33, %v2269_v11  ;;  %v3013_v62 = vpop.f32.mrb[88].mxu0 }
 0x229   :  { %v3014_v4 = vpop.f32.mrb[89].mxu0 }
 0x22a   :  { %v3015_v38 = vadd.f32 %v3014_v4, %v3013_v62  ;;  %v3016_v35 = vpop.f32.mrb[90].mxu0  ;;  %3058 = vmatpush3.bf16.msra.mxu1 %v2304_v41 }
 0x22b   :  { %v3017_v10 = vpop.f32.mrb[91].mxu0  ;;  %3059 = vmatprep.subr.bf16.mxu1 %v3526_v20 }
 0x22c   :  { %v2277_v52 = vadd.f32 %v3015_v38, %v3769_v1  ;;  %v3018_v9 = vadd.f32 %v3017_v10, %v3016_v35 }
 0x22e   :  { %v2280_v46 = vadd.f32 %v3018_v9, %v3771_v23 }
 0x230   :  { %v2305_v32 = vpack.c.bf16 %v2280_v46, %v2277_v52  ;;  %v3019_v8 = vpop.f32.mrb[92].mxu0 }
 0x231   :  { %v3020_v47 = vpop.f32.mrb[93].mxu0 }
 0x232   :  { %v3021_v25 = vadd.f32 %v3020_v47, %v3019_v8  ;;  %v3022_v37 = vpop.f32.mrb[94].mxu0  ;;  %3060 = vmatpush3.bf16.msra.mxu1 %v2305_v32 }
 0x233   :  { %v3023_v61 = vpop.f32.mrb[95].mxu0  ;;  %3061 = vmatprep.subr.bf16.mxu1 %v3526_v20 }
 0x234   :  { %v2285_v44 = vadd.f32 %v3021_v25, %v3773_v45  ;;  %v3024_v42 = vadd.f32 %v3023_v61, %v3022_v37 }
 0x236   :  { %v2288_v63 = vadd.f32 %v3024_v42, %v3775_v28 }
 0x238   :  { %v2306_v39 = vpack.c.bf16 %v2288_v63, %v2285_v44  ;;  %v3025_v50 = vpop.f32.mrb[96].mxu0 }
 0x239   :  { %v3026_v1 = vpop.f32.mrb[97].mxu0 }
 0x23a   :  { %v3027_v54 = vadd.f32 %v3026_v1, %v3025_v50  ;;  %v3028_v40 = vpop.f32.mrb[98].mxu0  ;;  %3062 = vmatpush3.bf16.msra.mxu1 %v2306_v39 }
 0x23b   :  { %v3029_v23 = vpop.f32.mrb[99].mxu0  ;;  %3063 = vmatprep.subr.bf16.mxu1 %v3526_v20 }
 0x23c   :  { %v2293_v49 = vadd.f32 %v3027_v54, %v3777_v19  ;;  %v3030_v60 = vadd.f32 %v3029_v23, %v3028_v40 }
 0x23e   :  { %v2296_v3 = vadd.f32 %v3030_v60, %v3779_v30 }
 0x240   :  { %v2307_v13 = vpack.c.bf16 %v2296_v3, %v2293_v49 }
 0x242   :  { %3064 = vmatpush3.bf16.msra.mxu1 %v2307_v13 }
 0x243   :  { %3069 = vmatprep.subr.bf16.mxu1 %v3526_v20 }
 0x245   :  { %3066 = vmatmul.mubr.bf16.vlgmr.msra.gmra.mrb[96].mxu1 %v2299_v27 }
 0x246   :  { %3070 = vmatpush3.bf16.msra.mxu1 %v1326_v12  ;;  %3085 = vmatprep.mubr.msk.bf16.mxu1 %vm3527_vm0, %v3526_v20 }
 0x247   :  { %3071 = vmatprep.subr.bf16.mxu1 %v3526_v20 }
 0x24a   :  { %3072 = vmatpush3.bf16.msra.mxu1 %v1327_v43 }
 0x24b   :  { %3073 = vmatprep.subr.bf16.mxu1 %v3526_v20 }
 0x24e   :  { %3074 = vmatpush3.bf16.msra.mxu1 %v1328_v2 }
 0x24f   :  { %3075 = vmatprep.subr.bf16.mxu1 %v3526_v20 }
 0x252   :  { %3076 = vmatpush3.bf16.msra.mxu1 %v1329_v31 }
 0x253   :  { %3077 = vmatprep.subr.bf16.mxu1 %v3526_v20 }
 0x256   :  { %3078 = vmatpush3.bf16.msra.mxu1 %v1330_v57 }
 0x257   :  { %3079 = vmatprep.subr.bf16.mxu1 %v3526_v20 }
 0x25a   :  { %3080 = vmatpush3.bf16.msra.mxu1 %v1331_v55 }
 0x25b   :  { %3081 = vmatprep.subr.bf16.mxu1 %v3526_v20 }
 0x25e   :  { %3082 = vmatpush3.bf16.msra.mxu1 %v1332_v0 }
 0x25f   :  { %3083 = vmatprep.subr.bf16.mxu1 %v3526_v20  ;;  %v2646_v20 = vld [vmem:[%s3868_s6] ss:$0 sm:$0xff] }
 0x262   :  { %3084 = vmatpush3.bf16.msra.mxu1 %v3870_v18 }
 0x265   :  { %3086 = vmatmul.mubr.bf16.vlgmr.msra.gmra.mrb[100].mxu1 %v3871_v24 }
 0x271   :  { %v123_v34 = vpop.xlane.xlu0 %122 }
 0x276   :  { %v126_v2 = vpop.xlane.xlu0 %125 }
 0x318   :  { %v2342_v27 = vpop.f32.mrb[96].mxu1 }
 0x319   :  { %v3067_v6 = vpop.f32.mrb[97].mxu1 }
 0x31a   :  { %v2345_v7 = vpop.f32.mrb[98].mxu1 }
 0x31b   :  { %v3068_v12 = vpop.f32.mrb[99].mxu1 }
 0x338   :  { %v2383_v36 = vpop.f32.mrb[100].mxu1 }
 0x339   :  { %v2384_v43 = vadd.f32 %v2383_v36, %v2342_v27  ;;  %v3087_v58 = vpop.f32.mrb[101].mxu1 }
 0x33a   :  { %v2386_v59 = vpop.f32.mrb[102].mxu1 }
 0x33b   :  { %v2390_v22 = vadd.f32 %v2384_v43, %v123_v34  ;;  %v2387_v26 = vadd.f32 %v2386_v59, %v2345_v7  ;;  %v3088_v31 = vpop.f32.mrb[103].mxu1 }
 0x33d   :  { %v2391_v17 = vadd.f32 %v2387_v26, %v126_v2  ;;  %v2399_v21 = vadd.f32 %v2646_v20, %v2390_v22 }
 0x33f   :  { %v2400_v51 = vadd.f32 %v2646_v20, %v2391_v17  ;;  %2401 = vst [vmem:[#allocation10] sm:$0xff] %v2399_v21 }
 0x341   :  { %2402 = vst [vmem:[#allocation10 + $0x8] sm:$0xff] %v2400_v51 }
 0x342   :  { %3495 = shalt.err (!%p3492_p8)
}
 0x343   :  { %s3496_s16 = scalar_lea.hbm %s3869_s7, 256 }
 0x344   :  { %p3497_p9 = scmp.ne.s32.totalorder %s3869_s7, %s3496_s16  ;;  %p3500_p10 = scmp.lt.u32.totalorder %s3496_s16, %s3869_s7 }
 0x346   :  { %p3502_p11 = pnand %p3500_p10, %p3497_p9 }
 0x348   :  { %3505 = shalt.err (!%p3502_p11)
}
 0x349   :  { %2414 = dma.vmem_to_hbm [thread:$0]  %s2409_s15, 256, %s3869_s7, [#allocation4], %s3515_s11, %s3515_s11, %s3516_s12  }
 0x34a   :  { %3512 = dma.done.wait [#allocation4], 256  }
 0x34b   :  { %3513 = vsyncadd [#allocation4], 4294967040 }
 0x34c   :  { %2418 = vsyncpa [#allocation3], 1 }
 0x34d   :  { %2419 = vsyncpa [#allocation6], 1 }
 0x34e   :  { %2420 = vsyncpa [#allocation9], 1 }
 0x34f   :  { %2421 = vsyncpa [#allocation4], 1 }

</bundles_post_ra>
